<compile_context>
chip_gen: v6e
topology: v6e:2x2x1
jax: 0.10.0
libtpu: 0.0.40
codegen_flags: <defaults>
</compile_context>

<pallas_src>
import jax
import jax.numpy as jnp
from jax.experimental import pallas as pl
from jax.experimental.pallas import tpu as pltpu


# ------------------------------ fused kernel --------------------------------

def _net1_kernel(img_ref, t1_ref, b1_ref, e1_ref, o1_ref, s1e_ref, s1o_ref,
                 t2_ref, b2_ref, e2_ref, o2_ref, s2e_ref, s2o_ref,
                 g1_ref, fb1_ref, w2f_ref, fb2_ref, out_ref):
    f32 = jnp.float32
    x = img_ref[0]                                            # (28, 28)

    # conv1: out[y, x*10+c] via 5 banded matmuls (no im2col).
    c1 = jnp.zeros((24, 240), f32)
    for kh in range(5):
        c1 = c1 + jnp.dot(x[kh:kh + 24, :], t1_ref[kh],
                          preferred_element_type=f32)
    r1 = jnp.maximum(c1 + b1_ref[...], 0.0)                   # (24, 240)

    # maxpool1 2x2: W-pairs via lane selections, H-pairs via row selections.
    pw1 = jnp.maximum(jnp.dot(r1, e1_ref[...], preferred_element_type=f32),
                      jnp.dot(r1, o1_ref[...], preferred_element_type=f32))
    p1 = jnp.maximum(jnp.dot(s1e_ref[...], pw1, preferred_element_type=f32),
                     jnp.dot(s1o_ref[...], pw1, preferred_element_type=f32))
    # p1: (12, 120) == pool1[h, w*10 + c]

    # conv2: out[y, x*20+d] via 5 banded matmuls over packed pool1 rows.
    c2 = jnp.zeros((8, 160), f32)
    for kh in range(5):
        c2 = c2 + jnp.dot(p1[kh:kh + 8, :], t2_ref[kh],
                          preferred_element_type=f32)
    r2 = jnp.maximum(c2 + b2_ref[...], 0.0)                   # (8, 160)

    # maxpool2 2x2.
    pw2 = jnp.maximum(jnp.dot(r2, e2_ref[...], preferred_element_type=f32),
                      jnp.dot(r2, o2_ref[...], preferred_element_type=f32))
    p2 = jnp.maximum(jnp.dot(s2e_ref[...], pw2, preferred_element_type=f32),
                     jnp.dot(s2o_ref[...], pw2, preferred_element_type=f32))
    # p2: (4, 80) == pool2[h, w*20 + d]

    # fc1 + fc2 fused; fc1 rows already permuted to the packed flatten order.
    h = fb1_ref[...]                                          # (1, 128)
    for q in range(4):
        h = h + jnp.dot(p2[q:q + 1, :], g1_ref[q * 80:(q + 1) * 80, :],
                        preferred_element_type=f32)
    out_ref[0] = jnp.dot(h, w2f_ref[...],
                         preferred_element_type=f32) + fb2_ref[...]


# ------------------------------ wrapper --------------------------------------

def _resident(a):
    zeros = (0,) * a.ndim
    return pl.BlockSpec(a.shape, lambda i, _z=zeros: _z)


def net1_forward(packed, x_nchw):
    """x_nchw: (B, 1, 28, 28) float32 -- same NCHW input as the PyTorch module."""
    b = x_nchw.shape[0]
    img = x_nchw.reshape(b, 28, 28)
    ins = list(packed)
    out = pl.pallas_call(
        _net1_kernel,
        out_shape=jax.ShapeDtypeStruct((b, 1, 128), jnp.float32),
        grid=(b,),
        in_specs=[pl.BlockSpec((1, 28, 28), lambda i: (i, 0, 0))]
                 + [_resident(a) for a in ins],
        out_specs=pl.BlockSpec((1, 1, 128), lambda i: (i, 0, 0)),
        compiler_params=pltpu.CompilerParams(
            dimension_semantics=("parallel",)),
    )(img, *ins)
    return out.reshape(b, 128)[:, :4]


# --------------------- host-side weight preprocessing ------------------------

def pack_params(p):
    f32 = jnp.float32
    w1, b1 = p["conv1_w"], p["conv1_b"]          # (5,5,10), (10,)
    w2, b2 = p["conv2_w"], p["conv2_b"]          # (5,5,10,20), (20,)

    # conv1 banded weights: t1[kh, i, x*10+c] = w1[kh, i-x, c] if 0<=i-x<5.
    i_ = jnp.arange(28)[:, None]
    x_ = jnp.arange(24)[None, :]
    kw1 = i_ - x_
    v1 = (kw1 >= 0) & (kw1 < 5)
    t1 = w1[:, jnp.clip(kw1, 0, 4), :]                       # (5, 28, 24, 10)
    t1 = jnp.where(v1[None, :, :, None], t1, 0.0).reshape(5, 28, 240)
    b1p = jnp.tile(b1, 24).reshape(1, 240)

    # pool1 selection matrices (exact 0/1 gathers).
    lin = jnp.arange(240)[:, None]
    lout = jnp.arange(120)[None, :]
    pp, cc = lout // 10, lout % 10
    e1 = (lin == 2 * pp * 10 + cc).astype(f32)
    o1 = (lin == (2 * pp + 1) * 10 + cc).astype(f32)
    q_ = jnp.arange(12)[:, None]
    y_ = jnp.arange(24)[None, :]
    s1e = (y_ == 2 * q_).astype(f32)
    s1o = (y_ == 2 * q_ + 1).astype(f32)

    # conv2 banded weights: t2[kh, j*10+c, x*20+d] = w2[kh, j-x, c, d].
    j_ = jnp.arange(12)[:, None]
    x2 = jnp.arange(8)[None, :]
    kw2 = j_ - x2
    v2 = (kw2 >= 0) & (kw2 < 5)
    t2 = w2[:, jnp.clip(kw2, 0, 4), :, :]                    # (5, 12, 8, 10, 20)
    t2 = jnp.where(v2[None, :, :, None, None], t2, 0.0)
    t2 = t2.transpose(0, 1, 3, 2, 4).reshape(5, 120, 160)
    b2p = jnp.tile(b2, 8).reshape(1, 160)

    # pool2 selection matrices.
    lin2 = jnp.arange(160)[:, None]
    lout2 = jnp.arange(80)[None, :]
    p2_, d2_ = lout2 // 20, lout2 % 20
    e2 = (lin2 == 2 * p2_ * 20 + d2_).astype(f32)
    o2 = (lin2 == (2 * p2_ + 1) * 20 + d2_).astype(f32)
    q2 = jnp.arange(4)[:, None]
    y2 = jnp.arange(8)[None, :]
    s2e = (y2 == 2 * q2).astype(f32)
    s2o = (y2 == 2 * q2 + 1).astype(f32)

    # fc1: permute rows from torch NCHW flatten (c*16+h*4+w) to the kernel's
    # packed order (h*80 + w*20 + c); pad 50 -> 128 output lanes.
    hh = jnp.arange(4)[:, None, None]
    ww = jnp.arange(4)[None, :, None]
    dd = jnp.arange(20)[None, None, :]
    rt = (dd * 16 + hh * 4 + ww).reshape(320)
    g1 = jnp.pad(p["fc1_w"][rt, :], ((0, 0), (0, 78)))       # (320, 128)
    fb1 = jnp.pad(p["fc1_b"], (0, 78)).reshape(1, 128)
    w2f = jnp.zeros((128, 128), f32).at[:50, :4].set(p["fc2_w"])
    fb2 = jnp.pad(p["fc2_b"], (0, 124)).reshape(1, 128)

    return (t1, b1p, e1, o1, s1e, s1o, t2, b2p, e2, o2, s2e, s2o,
            g1, fb1, w2f, fb2)


# ----------------------------- params & reference ----------------------------

def init_params(key):
    ks = jax.random.split(key, 8)

    def u(k_, shape, fan_in):
        bound = 1.0 / jnp.sqrt(jnp.float32(fan_in))
        return jax.random.uniform(k_, shape, jnp.float32, -bound, bound)

    return {
        "conv1_w": u(ks[0], (5, 5, 10), 25),        # (kh, kw, cout), cin = 1
        "conv1_b": u(ks[1], (10,), 25),
        "conv2_w": u(ks[2], (5, 5, 10, 20), 250),   # (kh, kw, cin, cout)
        "conv2_b": u(ks[3], (20,), 250),
        "fc1_w": u(ks[4], (320, 50), 320),          # rows in torch NCHW order
        "fc1_b": u(ks[5], (50,), 320),
        "fc2_w": u(ks[6], (50, 4), 50),
        "fc2_b": u(ks[7], (4,), 50),
    }


def net1_reference(p, x_nchw):
    """Plain-JAX reference with identical semantics (for a sanity check)."""
    x = jnp.transpose(x_nchw, (0, 2, 3, 1))        # NHWC

    def conv(a, w, bias):
        k = w.shape[0]
        bsz, h, wd, _ = a.shape
        oh, ow = h - k + 1, wd - k + 1
        pats = jnp.stack([a[:, dy:dy + oh, dx:dx + ow, :]
                          for dy in range(k) for dx in range(k)], axis=3)
        cols = pats.reshape(bsz, oh, ow, -1)
        wm = w.reshape(-1, w.shape[-1])
        return jnp.einsum("bhwk,kc->bhwc", cols, wm) + bias

    def pool(a):
        bsz, h, wd, c = a.shape
        return a.reshape(bsz, h // 2, 2, wd // 2, 2, c).max(axis=(2, 4))

    a = pool(jnp.maximum(conv(x, p["conv1_w"].reshape(5, 5, 1, 10),
                              p["conv1_b"]), 0.0))
    a = pool(jnp.maximum(conv(a, p["conv2_w"], p["conv2_b"]), 0.0))
    flat = jnp.transpose(a, (0, 3, 1, 2)).reshape(x.shape[0], -1)  # NCHW flatten
    h = flat @ p["fc1_w"] + p["fc1_b"]
    return h @ p["fc2_w"] + p["fc2_b"]


if __name__ == "__main__":
    key = jax.random.PRNGKey(0)
    pkey, xkey = jax.random.split(key)
    params = init_params(pkey)
    x = jax.random.normal(xkey, (4, 1, 28, 28), jnp.float32)

    packed = pack_params(params)                     # one-time weight prep
    out = jax.block_until_ready(jax.jit(net1_forward)(packed, x))
    ref = jax.block_until_ready(net1_reference(params, x))

    assert out.shape == (4, 4) and out.dtype == jnp.float32
    assert bool(jnp.all(jnp.isfinite(out)))
    # Loose tolerance: TPU f32 matmuls (kernel and reference) may round
    # operands to bf16 internally; gross indexing errors would far exceed this.
    assert bool(jnp.allclose(out, ref, atol=2e-1, rtol=1e-1))
    print("KERNEL_OK")
</pallas_src>

<mosaic_0001>
module attributes {stable_mosaic.version = 11 : i64} {
  func.func @_net1_kernel(%arg0: i32, %arg1: memref<1x28x28xf32, #tpu.memory_space<vmem>>, %arg2: memref<5x28x240xf32, #tpu.memory_space<vmem>>, %arg3: memref<1x240xf32, #tpu.memory_space<vmem>>, %arg4: memref<240x120xf32, #tpu.memory_space<vmem>>, %arg5: memref<240x120xf32, #tpu.memory_space<vmem>>, %arg6: memref<12x24xf32, #tpu.memory_space<vmem>>, %arg7: memref<12x24xf32, #tpu.memory_space<vmem>>, %arg8: memref<5x120x160xf32, #tpu.memory_space<vmem>>, %arg9: memref<1x160xf32, #tpu.memory_space<vmem>>, %arg10: memref<160x80xf32, #tpu.memory_space<vmem>>, %arg11: memref<160x80xf32, #tpu.memory_space<vmem>>, %arg12: memref<4x8xf32, #tpu.memory_space<vmem>>, %arg13: memref<4x8xf32, #tpu.memory_space<vmem>>, %arg14: memref<320x128xf32, #tpu.memory_space<vmem>>, %arg15: memref<1x128xf32, #tpu.memory_space<vmem>>, %arg16: memref<128x128xf32, #tpu.memory_space<vmem>>, %arg17: memref<1x128xf32, #tpu.memory_space<vmem>>, %arg18: memref<1x1x128xf32, #tpu.memory_space<vmem>>) attributes {dimension_semantics = [#tpu.dimension_semantics<parallel>], iteration_bounds = array<i64: 4>, scalar_prefetch = 0 : i64, scratch_operands = 0 : i64, tpu.core_type = #tpu.core_type<tc>, window_params = [{transform_indices = @transform_0, window_bounds = array<i64: 1, 28, 28>}, {pipeline_mode = #tpu.pipeline_mode<synchronous>, transform_indices = @transform_1, window_bounds = array<i64: 5, 28, 240>}, {pipeline_mode = #tpu.pipeline_mode<synchronous>, transform_indices = @transform_2, window_bounds = array<i64: 1, 240>}, {pipeline_mode = #tpu.pipeline_mode<synchronous>, transform_indices = @transform_3, window_bounds = array<i64: 240, 120>}, {pipeline_mode = #tpu.pipeline_mode<synchronous>, transform_indices = @transform_4, window_bounds = array<i64: 240, 120>}, {pipeline_mode = #tpu.pipeline_mode<synchronous>, transform_indices = @transform_5, window_bounds = array<i64: 12, 24>}, {pipeline_mode = #tpu.pipeline_mode<synchronous>, transform_indices = @transform_6, window_bounds = array<i64: 12, 24>}, {pipeline_mode = #tpu.pipeline_mode<synchronous>, transform_indices = @transform_7, window_bounds = array<i64: 5, 120, 160>}, {pipeline_mode = #tpu.pipeline_mode<synchronous>, transform_indices = @transform_8, window_bounds = array<i64: 1, 160>}, {pipeline_mode = #tpu.pipeline_mode<synchronous>, transform_indices = @transform_9, window_bounds = array<i64: 160, 80>}, {pipeline_mode = #tpu.pipeline_mode<synchronous>, transform_indices = @transform_10, window_bounds = array<i64: 160, 80>}, {pipeline_mode = #tpu.pipeline_mode<synchronous>, transform_indices = @transform_11, window_bounds = array<i64: 4, 8>}, {pipeline_mode = #tpu.pipeline_mode<synchronous>, transform_indices = @transform_12, window_bounds = array<i64: 4, 8>}, {pipeline_mode = #tpu.pipeline_mode<synchronous>, transform_indices = @transform_13, window_bounds = array<i64: 320, 128>}, {pipeline_mode = #tpu.pipeline_mode<synchronous>, transform_indices = @transform_14, window_bounds = array<i64: 1, 128>}, {pipeline_mode = #tpu.pipeline_mode<synchronous>, transform_indices = @transform_15, window_bounds = array<i64: 128, 128>}, {pipeline_mode = #tpu.pipeline_mode<synchronous>, transform_indices = @transform_16, window_bounds = array<i64: 1, 128>}, {transform_indices = @transform_17, window_bounds = array<i64: 1, 1, 128>}]} {
    %c0 = arith.constant 0 : index
    %c0_0 = arith.constant 0 : index
    %c0_1 = arith.constant 0 : index
    %0 = vector.load %arg1[%c0, %c0_0, %c0_1] : memref<1x28x28xf32, #tpu.memory_space<vmem>>, vector<1x28x28xf32>
    %1 = vector.shape_cast %0 : vector<1x28x28xf32> to vector<28x28xf32>
    %cst = arith.constant 0.000000e+00 : f32
    %2 = vector.broadcast %cst : f32 to vector<24x240xf32>
    %3 = vector.extract_strided_slice %1 {offsets = [0, 0], sizes = [24, 28], strides = [1, 1]} : vector<28x28xf32> to vector<24x28xf32>
    %c0_2 = arith.constant 0 : index
    %c0_3 = arith.constant 0 : index
    %c0_4 = arith.constant 0 : index
    %4 = vector.load %arg2[%c0_2, %c0_3, %c0_4] : memref<5x28x240xf32, #tpu.memory_space<vmem>>, vector<1x28x240xf32>
    %5 = vector.shape_cast %4 : vector<1x28x240xf32> to vector<28x240xf32>
    %cst_5 = arith.constant dense<0.000000e+00> : vector<24x240xf32>
    %6 = tpu.matmul %3, %5, %cst_5 {dimension_numbers = #tpu.dot_dimension_numbers<[1], [0], [0], [1], [0, 0, 1, 1], [], []>} : vector<24x28xf32>, vector<28x240xf32>, vector<24x240xf32> -> vector<24x240xf32>
    %7 = arith.addf %2, %6 : vector<24x240xf32>
    %8 = vector.extract_strided_slice %1 {offsets = [1, 0], sizes = [24, 28], strides = [1, 1]} : vector<28x28xf32> to vector<24x28xf32>
    %c1 = arith.constant 1 : index
    %c0_6 = arith.constant 0 : index
    %c0_7 = arith.constant 0 : index
    %9 = vector.load %arg2[%c1, %c0_6, %c0_7] : memref<5x28x240xf32, #tpu.memory_space<vmem>>, vector<1x28x240xf32>
    %10 = vector.shape_cast %9 : vector<1x28x240xf32> to vector<28x240xf32>
    %cst_8 = arith.constant dense<0.000000e+00> : vector<24x240xf32>
    %11 = tpu.matmul %8, %10, %cst_8 {dimension_numbers = #tpu.dot_dimension_numbers<[1], [0], [0], [1], [0, 0, 1, 1], [], []>} : vector<24x28xf32>, vector<28x240xf32>, vector<24x240xf32> -> vector<24x240xf32>
    %12 = arith.addf %7, %11 : vector<24x240xf32>
    %13 = vector.extract_strided_slice %1 {offsets = [2, 0], sizes = [24, 28], strides = [1, 1]} : vector<28x28xf32> to vector<24x28xf32>
    %c2 = arith.constant 2 : index
    %c0_9 = arith.constant 0 : index
    %c0_10 = arith.constant 0 : index
    %14 = vector.load %arg2[%c2, %c0_9, %c0_10] : memref<5x28x240xf32, #tpu.memory_space<vmem>>, vector<1x28x240xf32>
    %15 = vector.shape_cast %14 : vector<1x28x240xf32> to vector<28x240xf32>
    %cst_11 = arith.constant dense<0.000000e+00> : vector<24x240xf32>
    %16 = tpu.matmul %13, %15, %cst_11 {dimension_numbers = #tpu.dot_dimension_numbers<[1], [0], [0], [1], [0, 0, 1, 1], [], []>} : vector<24x28xf32>, vector<28x240xf32>, vector<24x240xf32> -> vector<24x240xf32>
    %17 = arith.addf %12, %16 : vector<24x240xf32>
    %18 = vector.extract_strided_slice %1 {offsets = [3, 0], sizes = [24, 28], strides = [1, 1]} : vector<28x28xf32> to vector<24x28xf32>
    %c3 = arith.constant 3 : index
    %c0_12 = arith.constant 0 : index
    %c0_13 = arith.constant 0 : index
    %19 = vector.load %arg2[%c3, %c0_12, %c0_13] : memref<5x28x240xf32, #tpu.memory_space<vmem>>, vector<1x28x240xf32>
    %20 = vector.shape_cast %19 : vector<1x28x240xf32> to vector<28x240xf32>
    %cst_14 = arith.constant dense<0.000000e+00> : vector<24x240xf32>
    %21 = tpu.matmul %18, %20, %cst_14 {dimension_numbers = #tpu.dot_dimension_numbers<[1], [0], [0], [1], [0, 0, 1, 1], [], []>} : vector<24x28xf32>, vector<28x240xf32>, vector<24x240xf32> -> vector<24x240xf32>
    %22 = arith.addf %17, %21 : vector<24x240xf32>
    %23 = vector.extract_strided_slice %1 {offsets = [4, 0], sizes = [24, 28], strides = [1, 1]} : vector<28x28xf32> to vector<24x28xf32>
    %c4 = arith.constant 4 : index
    %c0_15 = arith.constant 0 : index
    %c0_16 = arith.constant 0 : index
    %24 = vector.load %arg2[%c4, %c0_15, %c0_16] : memref<5x28x240xf32, #tpu.memory_space<vmem>>, vector<1x28x240xf32>
    %25 = vector.shape_cast %24 : vector<1x28x240xf32> to vector<28x240xf32>
    %cst_17 = arith.constant dense<0.000000e+00> : vector<24x240xf32>
    %26 = tpu.matmul %23, %25, %cst_17 {dimension_numbers = #tpu.dot_dimension_numbers<[1], [0], [0], [1], [0, 0, 1, 1], [], []>} : vector<24x28xf32>, vector<28x240xf32>, vector<24x240xf32> -> vector<24x240xf32>
    %27 = arith.addf %22, %26 : vector<24x240xf32>
    %c0_18 = arith.constant 0 : index
    %c0_19 = arith.constant 0 : index
    %28 = vector.load %arg3[%c0_18, %c0_19] : memref<1x240xf32, #tpu.memory_space<vmem>>, vector<1x240xf32>
    %29 = vector.broadcast %28 : vector<1x240xf32> to vector<24x240xf32>
    %30 = arith.addf %27, %29 : vector<24x240xf32>
    %cst_20 = arith.constant 0.000000e+00 : f32
    %31 = vector.broadcast %cst_20 : f32 to vector<24x240xf32>
    %32 = arith.maximumf %30, %31 : vector<24x240xf32>
    %c0_21 = arith.constant 0 : index
    %c0_22 = arith.constant 0 : index
    %33 = vector.load %arg4[%c0_21, %c0_22] : memref<240x120xf32, #tpu.memory_space<vmem>>, vector<240x120xf32>
    %cst_23 = arith.constant dense<0.000000e+00> : vector<24x120xf32>
    %34 = tpu.matmul %32, %33, %cst_23 {dimension_numbers = #tpu.dot_dimension_numbers<[1], [0], [0], [1], [0, 0, 1, 1], [], []>} : vector<24x240xf32>, vector<240x120xf32>, vector<24x120xf32> -> vector<24x120xf32>
    %c0_24 = arith.constant 0 : index
    %c0_25 = arith.constant 0 : index
    %35 = vector.load %arg5[%c0_24, %c0_25] : memref<240x120xf32, #tpu.memory_space<vmem>>, vector<240x120xf32>
    %cst_26 = arith.constant dense<0.000000e+00> : vector<24x120xf32>
    %36 = tpu.matmul %32, %35, %cst_26 {dimension_numbers = #tpu.dot_dimension_numbers<[1], [0], [0], [1], [0, 0, 1, 1], [], []>} : vector<24x240xf32>, vector<240x120xf32>, vector<24x120xf32> -> vector<24x120xf32>
    %37 = arith.maximumf %34, %36 : vector<24x120xf32>
    %c0_27 = arith.constant 0 : index
    %c0_28 = arith.constant 0 : index
    %38 = vector.load %arg6[%c0_27, %c0_28] : memref<12x24xf32, #tpu.memory_space<vmem>>, vector<12x24xf32>
    %cst_29 = arith.constant dense<0.000000e+00> : vector<12x120xf32>
    %39 = tpu.matmul %38, %37, %cst_29 {dimension_numbers = #tpu.dot_dimension_numbers<[1], [0], [0], [1], [0, 0, 1, 1], [], []>} : vector<12x24xf32>, vector<24x120xf32>, vector<12x120xf32> -> vector<12x120xf32>
    %c0_30 = arith.constant 0 : index
    %c0_31 = arith.constant 0 : index
    %40 = vector.load %arg7[%c0_30, %c0_31] : memref<12x24xf32, #tpu.memory_space<vmem>>, vector<12x24xf32>
    %cst_32 = arith.constant dense<0.000000e+00> : vector<12x120xf32>
    %41 = tpu.matmul %40, %37, %cst_32 {dimension_numbers = #tpu.dot_dimension_numbers<[1], [0], [0], [1], [0, 0, 1, 1], [], []>} : vector<12x24xf32>, vector<24x120xf32>, vector<12x120xf32> -> vector<12x120xf32>
    %42 = arith.maximumf %39, %41 : vector<12x120xf32>
    %cst_33 = arith.constant 0.000000e+00 : f32
    %43 = vector.broadcast %cst_33 : f32 to vector<8x160xf32>
    %44 = vector.extract_strided_slice %42 {offsets = [0, 0], sizes = [8, 120], strides = [1, 1]} : vector<12x120xf32> to vector<8x120xf32>
    %c0_34 = arith.constant 0 : index
    %c0_35 = arith.constant 0 : index
    %c0_36 = arith.constant 0 : index
    %45 = vector.load %arg8[%c0_34, %c0_35, %c0_36] : memref<5x120x160xf32, #tpu.memory_space<vmem>>, vector<1x120x160xf32>
    %46 = vector.shape_cast %45 : vector<1x120x160xf32> to vector<120x160xf32>
    %cst_37 = arith.constant dense<0.000000e+00> : vector<8x160xf32>
    %47 = tpu.matmul %44, %46, %cst_37 {dimension_numbers = #tpu.dot_dimension_numbers<[1], [0], [0], [1], [0, 0, 1, 1], [], []>} : vector<8x120xf32>, vector<120x160xf32>, vector<8x160xf32> -> vector<8x160xf32>
    %48 = arith.addf %43, %47 : vector<8x160xf32>
    %49 = vector.extract_strided_slice %42 {offsets = [1, 0], sizes = [8, 120], strides = [1, 1]} : vector<12x120xf32> to vector<8x120xf32>
    %c1_38 = arith.constant 1 : index
    %c0_39 = arith.constant 0 : index
    %c0_40 = arith.constant 0 : index
    %50 = vector.load %arg8[%c1_38, %c0_39, %c0_40] : memref<5x120x160xf32, #tpu.memory_space<vmem>>, vector<1x120x160xf32>
    %51 = vector.shape_cast %50 : vector<1x120x160xf32> to vector<120x160xf32>
    %cst_41 = arith.constant dense<0.000000e+00> : vector<8x160xf32>
    %52 = tpu.matmul %49, %51, %cst_41 {dimension_numbers = #tpu.dot_dimension_numbers<[1], [0], [0], [1], [0, 0, 1, 1], [], []>} : vector<8x120xf32>, vector<120x160xf32>, vector<8x160xf32> -> vector<8x160xf32>
    %53 = arith.addf %48, %52 : vector<8x160xf32>
    %54 = vector.extract_strided_slice %42 {offsets = [2, 0], sizes = [8, 120], strides = [1, 1]} : vector<12x120xf32> to vector<8x120xf32>
    %c2_42 = arith.constant 2 : index
    %c0_43 = arith.constant 0 : index
    %c0_44 = arith.constant 0 : index
    %55 = vector.load %arg8[%c2_42, %c0_43, %c0_44] : memref<5x120x160xf32, #tpu.memory_space<vmem>>, vector<1x120x160xf32>
    %56 = vector.shape_cast %55 : vector<1x120x160xf32> to vector<120x160xf32>
    %cst_45 = arith.constant dense<0.000000e+00> : vector<8x160xf32>
    %57 = tpu.matmul %54, %56, %cst_45 {dimension_numbers = #tpu.dot_dimension_numbers<[1], [0], [0], [1], [0, 0, 1, 1], [], []>} : vector<8x120xf32>, vector<120x160xf32>, vector<8x160xf32> -> vector<8x160xf32>
    %58 = arith.addf %53, %57 : vector<8x160xf32>
    %59 = vector.extract_strided_slice %42 {offsets = [3, 0], sizes = [8, 120], strides = [1, 1]} : vector<12x120xf32> to vector<8x120xf32>
    %c3_46 = arith.constant 3 : index
    %c0_47 = arith.constant 0 : index
    %c0_48 = arith.constant 0 : index
    %60 = vector.load %arg8[%c3_46, %c0_47, %c0_48] : memref<5x120x160xf32, #tpu.memory_space<vmem>>, vector<1x120x160xf32>
    %61 = vector.shape_cast %60 : vector<1x120x160xf32> to vector<120x160xf32>
    %cst_49 = arith.constant dense<0.000000e+00> : vector<8x160xf32>
    %62 = tpu.matmul %59, %61, %cst_49 {dimension_numbers = #tpu.dot_dimension_numbers<[1], [0], [0], [1], [0, 0, 1, 1], [], []>} : vector<8x120xf32>, vector<120x160xf32>, vector<8x160xf32> -> vector<8x160xf32>
    %63 = arith.addf %58, %62 : vector<8x160xf32>
    %64 = vector.extract_strided_slice %42 {offsets = [4, 0], sizes = [8, 120], strides = [1, 1]} : vector<12x120xf32> to vector<8x120xf32>
    %c4_50 = arith.constant 4 : index
    %c0_51 = arith.constant 0 : index
    %c0_52 = arith.constant 0 : index
    %65 = vector.load %arg8[%c4_50, %c0_51, %c0_52] : memref<5x120x160xf32, #tpu.memory_space<vmem>>, vector<1x120x160xf32>
    %66 = vector.shape_cast %65 : vector<1x120x160xf32> to vector<120x160xf32>
    %cst_53 = arith.constant dense<0.000000e+00> : vector<8x160xf32>
    %67 = tpu.matmul %64, %66, %cst_53 {dimension_numbers = #tpu.dot_dimension_numbers<[1], [0], [0], [1], [0, 0, 1, 1], [], []>} : vector<8x120xf32>, vector<120x160xf32>, vector<8x160xf32> -> vector<8x160xf32>
    %68 = arith.addf %63, %67 : vector<8x160xf32>
    %c0_54 = arith.constant 0 : index
    %c0_55 = arith.constant 0 : index
    %69 = vector.load %arg9[%c0_54, %c0_55] : memref<1x160xf32, #tpu.memory_space<vmem>>, vector<1x160xf32>
    %70 = vector.broadcast %69 : vector<1x160xf32> to vector<8x160xf32>
    %71 = arith.addf %68, %70 : vector<8x160xf32>
    %cst_56 = arith.constant 0.000000e+00 : f32
    %72 = vector.broadcast %cst_56 : f32 to vector<8x160xf32>
    %73 = arith.maximumf %71, %72 : vector<8x160xf32>
    %c0_57 = arith.constant 0 : index
    %c0_58 = arith.constant 0 : index
    %74 = vector.load %arg10[%c0_57, %c0_58] : memref<160x80xf32, #tpu.memory_space<vmem>>, vector<160x80xf32>
    %cst_59 = arith.constant dense<0.000000e+00> : vector<8x80xf32>
    %75 = tpu.matmul %73, %74, %cst_59 {dimension_numbers = #tpu.dot_dimension_numbers<[1], [0], [0], [1], [0, 0, 1, 1], [], []>} : vector<8x160xf32>, vector<160x80xf32>, vector<8x80xf32> -> vector<8x80xf32>
    %c0_60 = arith.constant 0 : index
    %c0_61 = arith.constant 0 : index
    %76 = vector.load %arg11[%c0_60, %c0_61] : memref<160x80xf32, #tpu.memory_space<vmem>>, vector<160x80xf32>
    %cst_62 = arith.constant dense<0.000000e+00> : vector<8x80xf32>
    %77 = tpu.matmul %73, %76, %cst_62 {dimension_numbers = #tpu.dot_dimension_numbers<[1], [0], [0], [1], [0, 0, 1, 1], [], []>} : vector<8x160xf32>, vector<160x80xf32>, vector<8x80xf32> -> vector<8x80xf32>
    %78 = arith.maximumf %75, %77 : vector<8x80xf32>
    %c0_63 = arith.constant 0 : index
    %c0_64 = arith.constant 0 : index
    %79 = vector.load %arg12[%c0_63, %c0_64] : memref<4x8xf32, #tpu.memory_space<vmem>>, vector<4x8xf32>
    %cst_65 = arith.constant dense<0.000000e+00> : vector<4x80xf32>
    %80 = tpu.matmul %79, %78, %cst_65 {dimension_numbers = #tpu.dot_dimension_numbers<[1], [0], [0], [1], [0, 0, 1, 1], [], []>} : vector<4x8xf32>, vector<8x80xf32>, vector<4x80xf32> -> vector<4x80xf32>
    %c0_66 = arith.constant 0 : index
    %c0_67 = arith.constant 0 : index
    %81 = vector.load %arg13[%c0_66, %c0_67] : memref<4x8xf32, #tpu.memory_space<vmem>>, vector<4x8xf32>
    %cst_68 = arith.constant dense<0.000000e+00> : vector<4x80xf32>
    %82 = tpu.matmul %81, %78, %cst_68 {dimension_numbers = #tpu.dot_dimension_numbers<[1], [0], [0], [1], [0, 0, 1, 1], [], []>} : vector<4x8xf32>, vector<8x80xf32>, vector<4x80xf32> -> vector<4x80xf32>
    %83 = arith.maximumf %80, %82 : vector<4x80xf32>
    %c0_69 = arith.constant 0 : index
    %c0_70 = arith.constant 0 : index
    %84 = vector.load %arg15[%c0_69, %c0_70] : memref<1x128xf32, #tpu.memory_space<vmem>>, vector<1x128xf32>
    %85 = vector.extract_strided_slice %83 {offsets = [0, 0], sizes = [1, 80], strides = [1, 1]} : vector<4x80xf32> to vector<1x80xf32>
    %c0_71 = arith.constant 0 : index
    %c0_72 = arith.constant 0 : index
    %86 = vector.load %arg14[%c0_71, %c0_72] : memref<320x128xf32, #tpu.memory_space<vmem>>, vector<80x128xf32>
    %cst_73 = arith.constant dense<0.000000e+00> : vector<1x128xf32>
    %87 = tpu.matmul %85, %86, %cst_73 {dimension_numbers = #tpu.dot_dimension_numbers<[1], [0], [0], [1], [0, 0, 1, 1], [], []>} : vector<1x80xf32>, vector<80x128xf32>, vector<1x128xf32> -> vector<1x128xf32>
    %88 = arith.addf %84, %87 : vector<1x128xf32>
    %89 = vector.extract_strided_slice %83 {offsets = [1, 0], sizes = [1, 80], strides = [1, 1]} : vector<4x80xf32> to vector<1x80xf32>
    %c80 = arith.constant 80 : index
    %c0_74 = arith.constant 0 : index
    %90 = vector.load %arg14[%c80, %c0_74] : memref<320x128xf32, #tpu.memory_space<vmem>>, vector<80x128xf32>
    %cst_75 = arith.constant dense<0.000000e+00> : vector<1x128xf32>
    %91 = tpu.matmul %89, %90, %cst_75 {dimension_numbers = #tpu.dot_dimension_numbers<[1], [0], [0], [1], [0, 0, 1, 1], [], []>} : vector<1x80xf32>, vector<80x128xf32>, vector<1x128xf32> -> vector<1x128xf32>
    %92 = arith.addf %88, %91 : vector<1x128xf32>
    %93 = vector.extract_strided_slice %83 {offsets = [2, 0], sizes = [1, 80], strides = [1, 1]} : vector<4x80xf32> to vector<1x80xf32>
    %c160 = arith.constant 160 : index
    %c0_76 = arith.constant 0 : index
    %94 = vector.load %arg14[%c160, %c0_76] : memref<320x128xf32, #tpu.memory_space<vmem>>, vector<80x128xf32>
    %cst_77 = arith.constant dense<0.000000e+00> : vector<1x128xf32>
    %95 = tpu.matmul %93, %94, %cst_77 {dimension_numbers = #tpu.dot_dimension_numbers<[1], [0], [0], [1], [0, 0, 1, 1], [], []>} : vector<1x80xf32>, vector<80x128xf32>, vector<1x128xf32> -> vector<1x128xf32>
    %96 = arith.addf %92, %95 : vector<1x128xf32>
    %97 = vector.extract_strided_slice %83 {offsets = [3, 0], sizes = [1, 80], strides = [1, 1]} : vector<4x80xf32> to vector<1x80xf32>
    %c240 = arith.constant 240 : index
    %c0_78 = arith.constant 0 : index
    %98 = vector.load %arg14[%c240, %c0_78] : memref<320x128xf32, #tpu.memory_space<vmem>>, vector<80x128xf32>
    %cst_79 = arith.constant dense<0.000000e+00> : vector<1x128xf32>
    %99 = tpu.matmul %97, %98, %cst_79 {dimension_numbers = #tpu.dot_dimension_numbers<[1], [0], [0], [1], [0, 0, 1, 1], [], []>} : vector<1x80xf32>, vector<80x128xf32>, vector<1x128xf32> -> vector<1x128xf32>
    %100 = arith.addf %96, %99 : vector<1x128xf32>
    %c0_80 = arith.constant 0 : index
    %c0_81 = arith.constant 0 : index
    %101 = vector.load %arg16[%c0_80, %c0_81] : memref<128x128xf32, #tpu.memory_space<vmem>>, vector<128x128xf32>
    %cst_82 = arith.constant dense<0.000000e+00> : vector<1x128xf32>
    %102 = tpu.matmul %100, %101, %cst_82 {dimension_numbers = #tpu.dot_dimension_numbers<[1], [0], [0], [1], [0, 0, 1, 1], [], []>} : vector<1x128xf32>, vector<128x128xf32>, vector<1x128xf32> -> vector<1x128xf32>
    %c0_83 = arith.constant 0 : index
    %c0_84 = arith.constant 0 : index
    %103 = vector.load %arg17[%c0_83, %c0_84] : memref<1x128xf32, #tpu.memory_space<vmem>>, vector<1x128xf32>
    %104 = arith.addf %102, %103 : vector<1x128xf32>
    %c0_85 = arith.constant 0 : index
    %c0_86 = arith.constant 0 : index
    %c0_87 = arith.constant 0 : index
    %105 = vector.load %arg18[%c0_85, %c0_86, %c0_87] : memref<1x1x128xf32, #tpu.memory_space<vmem>>, vector<1x1x128xf32>
    %106 = vector.shape_cast %105 : vector<1x1x128xf32> to vector<1x128xf32>
    %107 = vector.shape_cast %104 : vector<1x128xf32> to vector<1x1x128xf32>
    tpu.vector_store %arg18[%c0_85, %c0_86, %c0_87], %107 {strides = array<i32>} : memref<1x1x128xf32, #tpu.memory_space<vmem>>, vector<1x1x128xf32>,
    return
  }
  func.func @transform_0(%arg0: i32) -> (i32, i32, i32) {
    %c0_i32 = arith.constant 0 : i32
    %c0_i32_0 = arith.constant 0 : i32
    %c0_i32_1 = arith.constant 0 : i32
    return %arg0, %c0_i32, %c0_i32_0 : i32, i32, i32
  }
  func.func @transform_1(%arg0: i32) -> (i32, i32, i32) {
    %c0_i32 = arith.constant 0 : i32
    %c0_i32_0 = arith.constant 0 : i32
    %c0_i32_1 = arith.constant 0 : i32
    %c0_i32_2 = arith.constant 0 : i32
    return %c0_i32, %c0_i32_0, %c0_i32_1 : i32, i32, i32
  }
  func.func @transform_2(%arg0: i32) -> (i32, i32) {
    %c0_i32 = arith.constant 0 : i32
    %c0_i32_0 = arith.constant 0 : i32
    %c0_i32_1 = arith.constant 0 : i32
    return %c0_i32, %c0_i32_0 : i32, i32
  }
  func.func @transform_3(%arg0: i32) -> (i32, i32) {
    %c0_i32 = arith.constant 0 : i32
    %c0_i32_0 = arith.constant 0 : i32
    %c0_i32_1 = arith.constant 0 : i32
    return %c0_i32, %c0_i32_0 : i32, i32
  }
  func.func @transform_4(%arg0: i32) -> (i32, i32) {
    %c0_i32 = arith.constant 0 : i32
    %c0_i32_0 = arith.constant 0 : i32
    %c0_i32_1 = arith.constant 0 : i32
    return %c0_i32, %c0_i32_0 : i32, i32
  }
  func.func @transform_5(%arg0: i32) -> (i32, i32) {
    %c0_i32 = arith.constant 0 : i32
    %c0_i32_0 = arith.constant 0 : i32
    %c0_i32_1 = arith.constant 0 : i32
    return %c0_i32, %c0_i32_0 : i32, i32
  }
  func.func @transform_6(%arg0: i32) -> (i32, i32) {
    %c0_i32 = arith.constant 0 : i32
    %c0_i32_0 = arith.constant 0 : i32
    %c0_i32_1 = arith.constant 0 : i32
    return %c0_i32, %c0_i32_0 : i32, i32
  }
  func.func @transform_7(%arg0: i32) -> (i32, i32, i32) {
    %c0_i32 = arith.constant 0 : i32
    %c0_i32_0 = arith.constant 0 : i32
    %c0_i32_1 = arith.constant 0 : i32
    %c0_i32_2 = arith.constant 0 : i32
    return %c0_i32, %c0_i32_0, %c0_i32_1 : i32, i32, i32
  }
  func.func @transform_8(%arg0: i32) -> (i32, i32) {
    %c0_i32 = arith.constant 0 : i32
    %c0_i32_0 = arith.constant 0 : i32
    %c0_i32_1 = arith.constant 0 : i32
    return %c0_i32, %c0_i32_0 : i32, i32
  }
  func.func @transform_9(%arg0: i32) -> (i32, i32) {
    %c0_i32 = arith.constant 0 : i32
    %c0_i32_0 = arith.constant 0 : i32
    %c0_i32_1 = arith.constant 0 : i32
    return %c0_i32, %c0_i32_0 : i32, i32
  }
  func.func @transform_10(%arg0: i32) -> (i32, i32) {
    %c0_i32 = arith.constant 0 : i32
    %c0_i32_0 = arith.constant 0 : i32
    %c0_i32_1 = arith.constant 0 : i32
    return %c0_i32, %c0_i32_0 : i32, i32
  }
  func.func @transform_11(%arg0: i32) -> (i32, i32) {
    %c0_i32 = arith.constant 0 : i32
    %c0_i32_0 = arith.constant 0 : i32
    %c0_i32_1 = arith.constant 0 : i32
    return %c0_i32, %c0_i32_0 : i32, i32
  }
  func.func @transform_12(%arg0: i32) -> (i32, i32) {
    %c0_i32 = arith.constant 0 : i32
    %c0_i32_0 = arith.constant 0 : i32
    %c0_i32_1 = arith.constant 0 : i32
    return %c0_i32, %c0_i32_0 : i32, i32
  }
  func.func @transform_13(%arg0: i32) -> (i32, i32) {
    %c0_i32 = arith.constant 0 : i32
    %c0_i32_0 = arith.constant 0 : i32
    %c0_i32_1 = arith.constant 0 : i32
    return %c0_i32, %c0_i32_0 : i32, i32
  }
  func.func @transform_14(%arg0: i32) -> (i32, i32) {
    %c0_i32 = arith.constant 0 : i32
    %c0_i32_0 = arith.constant 0 : i32
    %c0_i32_1 = arith.constant 0 : i32
    return %c0_i32, %c0_i32_0 : i32, i32
  }
  func.func @transform_15(%arg0: i32) -> (i32, i32) {
    %c0_i32 = arith.constant 0 : i32
    %c0_i32_0 = arith.constant 0 : i32
    %c0_i32_1 = arith.constant 0 : i32
    return %c0_i32, %c0_i32_0 : i32, i32
  }
  func.func @transform_16(%arg0: i32) -> (i32, i32) {
    %c0_i32 = arith.constant 0 : i32
    %c0_i32_0 = arith.constant 0 : i32
    %c0_i32_1 = arith.constant 0 : i32
    return %c0_i32, %c0_i32_0 : i32, i32
  }
  func.func @transform_17(%arg0: i32) -> (i32, i32, i32) {
    %c0_i32 = arith.constant 0 : i32
    %c0_i32_0 = arith.constant 0 : i32
    %c0_i32_1 = arith.constant 0 : i32
    return %arg0, %c0_i32, %c0_i32_0 : i32, i32, i32
  }
}

</mosaic_0001>

<bundles_post_ra>
// kernel: net1_forward.1
= control target key start
LH: loop header
LB: loop body
LE: loop exit
PB: predicated region body
PF: predicated region fallthrough
CT: control target
= control target key end

     0   :  { %s5042_s0 = inlined_call_operand.vmem [shape: f32[4,28,28], index: 0, kind: input, shape index: {}]   ;;  %s5043_s1 = inlined_call_operand.vmem [shape: f32[5,28,240], index: 1, kind: input, shape index: {}]   ;;  %s5044_s2 = inlined_call_operand.vmem [shape: f32[1,240], index: 2, kind: input, shape index: {}]   ;;  %s5045_s3 = inlined_call_operand.vmem [shape: f32[240,120], index: 3, kind: input, shape index: {}]   ;;  %s5046_s4 = inlined_call_operand.vmem [shape: f32[240,120], index: 4, kind: input, shape index: {}]   ;;  %s5047_s5 = inlined_call_operand.vmem [shape: f32[12,24], index: 5, kind: input, shape index: {}]   ;;  %s5048_s6 = inlined_call_operand.vmem [shape: f32[12,24], index: 6, kind: input, shape index: {}]   ;;  %s5049_s7 = inlined_call_operand.vmem [shape: f32[5,120,160], index: 7, kind: input, shape index: {}]   ;;  %s5050_s8 = inlined_call_operand.vmem [shape: f32[1,160], index: 8, kind: input, shape index: {}]   ;;  %s5051_s9 = inlined_call_operand.vmem [shape: f32[160,80], index: 9, kind: input, shape index: {}]   ;;  %s5052_s10 = inlined_call_operand.vmem [shape: f32[160,80], index: 10, kind: input, shape index: {}]   ;;  %s5053_s11 = inlined_call_operand.vmem [shape: f32[4,8], index: 11, kind: input, shape index: {}]   ;;  %s5054_s12 = inlined_call_operand.vmem [shape: f32[4,8], index: 12, kind: input, shape index: {}]   ;;  %s5055_s13 = inlined_call_operand.vmem [shape: f32[320,128], index: 13, kind: input, shape index: {}]   ;;  %s5056_s14 = inlined_call_operand.vmem [shape: f32[1,128], index: 14, kind: input, shape index: {}]   ;;  %s5057_s15 = inlined_call_operand.vmem [shape: f32[128,128], index: 15, kind: input, shape index: {}]   ;;  %s5058_s16 = inlined_call_operand.vmem [shape: f32[1,128], index: 16, kind: input, shape index: {}]   ;;  %s5059_s17 = inlined_call_operand.hbm [shape: f32[4,1,128], index: 17, kind: output, shape index: {}]  }
   0x1   :  { %5070 = sst [smem:[#allocation12_spill]] %s5042_s0 }
   0x2   :  { %5071 = sst [smem:[#allocation13_spill]] %s5043_s1 }
   0x3   :  { %5072 = sst [smem:[#allocation14_spill]] %s5058_s16 }
   0x4   :  { %5073 = sst [smem:[#allocation15_spill]] %s5059_s17 }
   0x5   :  { %22 = vsyncpa [#allocation3], 0 }
   0x6   :  { %24 = vsyncpa [#allocation3 + $0x1], 0  ;;  %s3571_s24 = smov 0   ;;  %s3573_s25 = smov 0  }
   0x7   :  { %s3575_s26 = smov 0   ;;  %s3577_s27 = smov 0  }
   0x8 LB: > { %5074 = sst [smem:[#allocation5_spill]] %s3464_s24  ;;  %s3592_s28 = sadd.s32 4294967295, %s3476_s27   ;;  %s3476_s27 = sphi %s3577_s27, %s5091_s27   ;;  %s3472_s26 = sphi %s3575_s26, %s5093_s26   ;;  %s3468_s25 = sphi %s3573_s25, %s5095_s25   ;;  %s3464_s24 = sphi %s3571_s24, %s5094_s24  }
   0x9   : > { %5075 = sst [smem:[#allocation6_spill]] %s3472_s26  ;;  %s2935_s29 = sadd.s32 4294967294, %s3476_s27  }
   0xa   : > { %5076 = sst [smem:[#allocation7_spill]] %s3476_s27  ;;  %s3596_s0 = sadd.s32 1, %s3476_s27  }
   0xb   : > { %5077 = sst [smem:[#allocation8_spill]] %s3596_s0  ;;  %s399_s30 = sadd.s32 1, %s3472_s26 }
   0xc   : > { %s396_s18 = ssub.s32 %s3476_s27, %s3596_s0  ;;  %p409_p0 = scmp.ne.s32.totalorder %s3472_s26, %s3468_s25 }
   0xd   : > { %p397_p1 = scmp.eq.s32.totalorder %s396_s18, 0  ;;  %p410_p2 = scmp.eq.s32.totalorder %s3592_s28, 3 }
   0xe   : > { %p415_p3 = scmp.ne.s32.totalorder %s3468_s25, %s3464_s24  ;;  %p416_p4 = scmp.eq.s32.totalorder %s2935_s29, 3 }
   0xf   : > { %s3607_s19 = scalar_select %p397_p1, %s3472_s26, %s399_s30  }
  0x10   : > { %p3609_p5 = por %p410_p2, %p409_p0  ;;  %p3613_p6 = por %p416_p4, %p415_p3 }
  0x11   : > { %5078 = sst [smem:[#allocation9_spill]] %s3607_s19  ;;  %p2938_p7 = scmp.ge.s32.totalorder %s3476_s27, 1 }
  0x12   : > { %s5079_s1 = scalar_select %p3609_p5, 1, 0 }
  0x13   : > { %s5081_s20 = scalar_select %p3613_p6, 1, 0 }
  0x14   : > { %5080 = sst [smem:[#allocation10_spill]] %s5079_s1  ;;  %p490_p8 = scmp.lt.s32.totalorder %s3476_s27, 5 }
  0x15   : > { %5082 = sst [smem:[#allocation11_spill]] %s5081_s20 }
  0x16   : > { %p491_p9 = pnand %p2938_p7, %p490_p8 }
  0x17   : > { %s5083_s23 = sld [smem:[#allocation13_spill]] (!%p491_p9)  ;;  %p541_p10 = scmp.lt.s32.totalorder (!%p491_p9), %s3592_s28, 3 }
  0x18   : > { %494 = sbr.rel (%p491_p9) target bundleno = 1773 (0x6ed), region = 88  ;;  %s5084_s27 = sld [smem:[#allocation12_spill]] (!%p491_p9) }
  0x19   : > { %s539_s20 = sand.u32 (!%p491_p9), 1, %s3468_s25   ;;  %s5086_s0 = sld [smem:[#allocation14_spill]] (!%p491_p9) }
  0x1a   : > { %s3141_s18 = sshll.u32 (!%p491_p9), %s3592_s28, 4  ;;  %s540_s21 = scalar_lea.vmem (!%p491_p9), [#allocation2], %s539_s20 }
  0x1b   : > { %s5087_s16 = sld [smem:[#allocation15_spill]] (!%p491_p9)  ;;  %s2868_s24 = scalar_lea.sflag (!%p491_p9), [#allocation3], %s539_s20 }
  0x1d   : > { %v2948_v0 = vld [vmem:[%s5083_s23 + $0x78] sm:$0xf]  ;;  %vm586_vm0 = vcmask 1043456   ;;  %v2947_v1 = vld [vmem:[%s5083_s23 + $0x70] sm:$0xf]  ;;  %v2946_v2 = vld [vmem:[%s5083_s23 + $0x68] sm:$0xff] }
  0x1e   : > { %2949 = vmatprep.subr.msk.mxu0 %vm586_vm0, %v2948_v0  ;;  %v2945_v3 = vld [vmem:[%s5083_s23 + $0x60] sm:$0xff]  ;;  %v2944_v4 = vld [vmem:[%s5083_s23 + $0x58] sm:$0xff]  ;;  %v3478_v5 = vmov 0.0   ;;  %v2943_v6 = vld [vmem:[%s5083_s23 + $0x50] sm:$0xff]  ;;  %s542_s30 = scalar_select %p541_p10, %s3592_s28, 3  ;;  %vm571_vm1 = vcmask 1046528  }
  0x1f   : > { %2950 = vmatpush1.msk.msra.mxu0 %vm586_vm0, %v2947_v1  ;;  %657 = vmatprep.mubr.f32.mxu0 %v3478_v5  ;;  %v2942_v7 = vld [vmem:[%s5083_s23 + $0x48] sm:$0xff]  ;;  %v2941_v8 = vld [vmem:[%s5083_s23 + $0x40] sm:$0xff]  ;;  %v557_v9 = vld [vmem:[%s5083_s23 + $0x38] sm:$0xf]  ;;  %vm579_vm2 = vcmask 228352   ;;  %vm898_vm3 = vcmask 1044480  }
  0x20   : > { %619 = vmatprep.subr.mxu0 %v2946_v2  ;;  %982 = vmatprep.mubr.f32.mxu1 %v3478_v5  ;;  %s3144_s22 = sshll.u32 %s542_s30, 5  ;;  %v2979_v10 = vld [vmem:[%s5083_s23 + $0xf8] sm:$0xf]  ;;  %v556_v17 = vld [vmem:[%s5083_s23 + $0x30] sm:$0xf]  ;;  %v2977_v20 = vld [vmem:[%s5083_s23 + $0xe8] sm:$0xff] }
  0x21   : > { %620 = vmatpush1.msra.mxu0 %v2945_v3  ;;  %s545_s29 = scalar_lea.vmem %s5084_s27, %s3144_s22  ;;  %2980 = vmatprep.subr.msk.mxu1 %vm586_vm0, %v2979_v10  ;;  %v2978_v19 = vld [vmem:[%s5083_s23 + $0xf0] sm:$0xf]  ;;  %v555_v22 = vld [vmem:[%s5083_s23 + $0x28] sm:$0xff]  ;;  %v2976_v23 = vld [vmem:[%s5083_s23 + $0xe0] sm:$0xff]  ;;  %vm780_vm4 = vcmask 1045504   ;;  %vm1178_vm5 = vcmask 916480   ;;  %s5007_s17 = scalar_lea.hbm %s5087_s16, %s3141_s18 }
  0x22   : > { %621 = vmatprep.subr.mxu0 %v2944_v4  ;;  %v3658_v11 = vld [vmem:[%s545_s29] sm:$0xff]  ;;  %v3660_v12 = vld [vmem:[%s545_s29 + $0x8] sm:$0xff]  ;;  %v3662_v13 = vld [vmem:[%s545_s29 + $0x10] sm:$0xff]  ;;  %2981 = vmatpush1.msk.msra.mxu1 %vm586_vm0, %v2978_v19  ;;  %vm1383_vm6 = vcmask 195584   ;;  %vm1616_vm7 = vcmask 982016   ;;  %vm2126_vm8 = vcmask 261120  }
  0x23   : > { %622 = vmatpush1.msra.mxu0 %v2943_v6  ;;  %v572_v14 = vrot.slane %v3658_v11, 1  ;;  %v573_v15 = vrot.slane %v3660_v12, 1  ;;  %v575_v16 = vrot.slane %v3662_v13, 1  ;;  %v3672_v18 = vld [vmem:[%s545_s29 + $0x18] sm:$0xf]  ;;  %v554_v24 = vld [vmem:[%s5083_s23 + $0x20] sm:$0xff]  ;;  %944 = vmatprep.subr.mxu1 %v2977_v20 }
  0x24   : > { %623 = vmatprep.subr.mxu0 %v2942_v7  ;;  %v2975_v25 = vld [vmem:[%s5083_s23 + $0xd8] sm:$0xff]  ;;  %v577_v27 = vrot.slane %v3672_v18, 1  ;;  %v552_v29 = vld [vmem:[%s5083_s23 + $0x10] sm:$0xff]  ;;  %945 = vmatpush1.msra.mxu1 %v2976_v23  ;;  %v551_v30 = vld [vmem:[%s5083_s23 + $0x8] sm:$0xff]  ;;  %v899_v32 = vrot.slane %v3658_v11, 3  ;;  %v900_v33 = vrot.slane %v3660_v12, 3 }
  0x25   : > { %624 = vmatpush1.msra.mxu0 %v2941_v8  ;;  %v574_v21 = vsel %vm571_vm1, %v572_v14, %v573_v15  ;;  %v576_v26 = vsel %vm571_vm1, %v573_v15, %v575_v16  ;;  %v553_v28 = vld [vmem:[%s5083_s23 + $0x18] sm:$0xff]  ;;  %946 = vmatprep.subr.mxu1 %v2975_v25  ;;  %v2974_v31 = vld [vmem:[%s5083_s23 + $0xd0] sm:$0xff]  ;;  %v550_v34 = vld [vmem:[%s5083_s23] sm:$0xff]  ;;  %v902_v40 = vrot.slane %v3662_v13, 3  ;;  %v904_v45 = vrot.slane %v3672_v18, 3  ;;  %s2880_s22 = sshll.u32 %s540_s21, 4  ;;  %s2881_s22 = int_to_ptr.vmem [resolvable:$true] %s2880_s22 }
  0x26   : > { %2954 = vmatprep.subr.msk.mxu0 %vm586_vm0, %v557_v9  ;;  %2951 = vmatmul.mubr.msk.f32.vlgmr.msra.gmra.mxu0 %vm579_vm2, %v574_v21  ;;  %v2973_v35 = vld [vmem:[%s5083_s23 + $0xc8] sm:$0xff]  ;;  %v578_v36 = vsel %vm571_vm1, %v575_v16, %v577_v27  ;;  %v2966_v37 = vld [vmem:[%s5083_s23 + $0xb8] sm:$0xf]  ;;  %v2972_v38 = vld [vmem:[%s5083_s23 + $0xc0] sm:$0xff]  ;;  %v901_v39 = vsel %vm898_vm3, %v899_v32, %v900_v33  ;;  %v781_v53 = vrot.slane %v3658_v11, 2  ;;  %v782_v54 = vrot.slane %v3660_v12, 2 }
  0x27   : > { %663 = vmatprep.mubr.f32.mxu0 %v3478_v5  ;;  %2955 = vmatpush1.msk.msra.mxu0 %vm586_vm0, %v556_v17  ;;  %v1163_v41 = vld [vmem:[%s5045_s3 + $0x78] sm:$0xff]  ;;  %v2965_v42 = vld [vmem:[%s5083_s23 + $0xb0] sm:$0xf]  ;;  %v2964_v43 = vld [vmem:[%s5083_s23 + $0xa8] sm:$0xff]  ;;  %v903_v44 = vsel %vm898_vm3, %v900_v33, %v902_v40  ;;  %v905_v50 = vsel %vm898_vm3, %v902_v40, %v904_v45  ;;  %v784_v58 = vrot.slane %v3662_v13, 2  ;;  %v786_v1 = vrot.slane %v3672_v18, 2 }
  0x28   : > { %714 = vmatprep.subr.mxu0 %v555_v22  ;;  %947 = vmatpush1.msra.mxu1 %v2974_v31  ;;  %v2963_v46 = vld [vmem:[%s5083_s23 + $0xa0] sm:$0xff]  ;;  %v2962_v47 = vld [vmem:[%s5083_s23 + $0x98] sm:$0xff]  ;;  %v2961_v48 = vld [vmem:[%s5083_s23 + $0x90] sm:$0xff]  ;;  %v783_v57 = vsel %vm780_vm4, %v781_v53, %v782_v54  ;;  %v1016_v9 = vrot.slane %v3658_v11, 4  ;;  %v1017_v10 = vrot.slane %v3660_v12, 4  ;;  %vm3479_vm9 = vmmov 0  }
  0x29   : > { %715 = vmatpush1.msra.mxu0 %v554_v24  ;;  %948 = vmatprep.subr.mxu1 %v2973_v35  ;;  %v2960_v49 = vld [vmem:[%s5083_s23 + $0x88] sm:$0xff]  ;;  %v2959_v51 = vld [vmem:[%s5083_s23 + $0x80] sm:$0xff]  ;;  %v1162_v52 = vld [vmem:[%s5045_s3 + $0x70] sm:$0xff]  ;;  %v785_v0 = vsel %vm780_vm4, %v782_v54, %v784_v58  ;;  %v787_v8 = vsel %vm780_vm4, %v784_v58, %v786_v1  ;;  %vm2292_vm10 = vcmask 64512   ;;  %vm2452_vm11 = vcmask 654336   ;;  %s3416_s27 = scalar_lea.vmem %s2881_s22, 16 }
  0x2a   : > { %2952 = vmatmul.mubr.msk.f32.gmra.mxu0 %vm579_vm2, %v576_v26  ;;  %716 = vmatprep.subr.mxu0 %v553_v28  ;;  %v2992_v55 = vld [vmem:[%s5083_s23 + $0x138] sm:$0xf]  ;;  %v1161_v56 = vld [vmem:[%s5045_s3 + $0x68] sm:$0xff]  ;;  %v1160_v59 = vld [vmem:[%s5045_s3 + $0x60] sm:$0xff]  ;;  %v1018_v15 = vsel %vm586_vm0, %v1016_v9, %v1017_v10  ;;  %p3417_p11 = scmp.ne.s32.totalorder %s2881_s22, %s3416_s27  ;;  %s3480_s30 = smov [#allocation2]  }
  0x2b   : > { %669 = vmatprep.mubr.f32.mxu0 %v3478_v5  ;;  %717 = vmatpush1.msra.mxu0 %v552_v29  ;;  %v2991_v60 = vld [vmem:[%s5083_s23 + $0x130] sm:$0xf]  ;;  %v2990_v61 = vld [vmem:[%s5083_s23 + $0x128] sm:$0xff]  ;;  %v2989_v62 = vld [vmem:[%s5083_s23 + $0x120] sm:$0xff]  ;;  %s3420_s28 = sshll.u32 %s3480_s30, 4  ;;  %s3421_s28 = int_to_ptr.vmem [resolvable:$false] %s3420_s28 }
  0x2c   : > { %718 = vmatprep.subr.mxu0 %v551_v30  ;;  %949 = vmatpush1.msra.mxu1 %v2972_v38  ;;  %v1159_v63 = vld [vmem:[%s5045_s3 + $0x58] sm:$0xff]  ;;  %v2987_v3 = vld [vmem:[%s5083_s23 + $0x110] sm:$0xff]  ;;  %v2986_v4 = vld [vmem:[%s5083_s23 + $0x108] sm:$0xff]  ;;  %p3418_p12 = pnand %p3417_p11, %p3609_p5  ;;  %s3422_s26 = scalar_lea.vmem %s3421_s28, 32 }
  0x2d   : > { %719 = vmatpush1.msra.mxu0 %v550_v34  ;;  %2982 = vmatmul.mubr.msk.f32.vlgmr.msra.gmra.mxu1 %vm579_vm2, %v901_v39  ;;  %v2988_v2 = vld [vmem:[%s5083_s23 + $0x118] sm:$0xff]  ;;  %v2985_v6 = vld [vmem:[%s5083_s23 + $0x100] sm:$0xff]  ;;  %v1158_v7 = vld [vmem:[%s5045_s3 + $0x50] sm:$0xff]  ;;  %p3423_p0 = scmp.lt.s32.totalorder %s2881_s22, %s3421_s28  ;;  %p3424_p1 = scmp.lt.s32.totalorder %s3422_s26, %s3416_s27 }
  0x2e   : > { %2953 = vmatmul.mubr.msk.f32.gmra.mxu0 %vm579_vm2, %v578_v36  ;;  %2967 = vmatprep.subr.msk.mxu0 %vm586_vm0, %v2966_v37  ;;  %v1157_v14 = vld [vmem:[%s5045_s3 + $0x48] sm:$0xff]  ;;  %v1282_v16 = vld [vmem:[%s5046_s4 + $0x70] sm:$0xff]  ;;  %v1280_v20 = vld [vmem:[%s5046_s4 + $0x60] sm:$0xff]  ;;  %p3419_p13 = pneg %p3418_p12 }
  0x2f   : > { %752 = vmatprep.mubr.f32.mxu0 %v3478_v5  ;;  %1188 = vmatprep.subr.mxu1 %v3478_v5  ;;  %v1281_v19 = vld [vmem:[%s5046_s4 + $0x68] sm:$0xff]  ;;  %v1279_v21 = vld [vmem:[%s5046_s4 + $0x58] sm:$0xff]  ;;  %v1278_v22 = vld [vmem:[%s5046_s4 + $0x50] sm:$0xff]  ;;  %p3425_p2 = por %p3424_p1, %p3423_p0 }
  0x30   : > { %988 = vmatprep.mubr.f32.mxu1 %v3478_v5  ;;  %1189 = vmatpush1.msra.mxu1 %v1163_v41  ;;  %v1277_v23 = vld [vmem:[%s5046_s4 + $0x48] sm:$0xff]  ;;  %v1156_v24 = vld [vmem:[%s5045_s3 + $0x40] sm:$0xff]  ;;  %v1155_v26 = vld [vmem:[%s5045_s3 + $0x38] sm:$0xff] }
  0x31   : > { %1190 = vmatprep.subr.mxu1 %v3478_v5  ;;  %2983 = vmatmul.mubr.msk.f32.gmra.mxu1 %vm579_vm2, %v903_v44  ;;  %v1276_v25 = vld [vmem:[%s5046_s4 + $0x40] sm:$0xff]  ;;  %v1275_v27 = vld [vmem:[%s5046_s4 + $0x38] sm:$0xff]  ;;  %v1154_v28 = vld [vmem:[%s5045_s3 + $0x30] sm:$0xff]  ;;  %p3426_p3 = pnand %p3425_p2, %p3419_p13 }
  0x32   : > { %2956 = vmatmul.mubr.msk.f32.vlgmr.msra.gmra.mxu0 %vm579_vm2, %v3658_v11  ;;  %994 = vmatprep.mubr.f32.mxu1 %v3478_v5  ;;  %v1019_v11 = vrot.slane %v3662_v13, 4  ;;  %v1274_v29 = vld [vmem:[%s5046_s4 + $0x30] sm:$0xff]  ;;  %v1153_v30 = vld [vmem:[%s5045_s3 + $0x28] sm:$0xff]  ;;  %v1152_v32 = vld [vmem:[%s5045_s3 + $0x20] sm:$0xff] }
  0x33   : > { %758 = vmatprep.mubr.f32.mxu0 %v3478_v5  ;;  %2968 = vmatpush1.msk.msra.mxu0 %vm586_vm0, %v2965_v42  ;;  %v1273_v31 = vld [vmem:[%s5046_s4 + $0x28] sm:$0xff]  ;;  %v1272_v33 = vld [vmem:[%s5046_s4 + $0x20] sm:$0xff]  ;;  %v1151_v34 = vld [vmem:[%s5045_s3 + $0x18] sm:$0xff] }
  0x34   : > { %826 = vmatprep.subr.mxu0 %v2964_v43  ;;  %1191 = vmatpush1.msra.mxu1 %v1162_v52  ;;  %v1020_v17 = vsel %vm586_vm0, %v1017_v10, %v1019_v11  ;;  %v1271_v35 = vld [vmem:[%s5046_s4 + $0x18] sm:$0xff]  ;;  %v1150_v36 = vld [vmem:[%s5045_s3 + $0x10] sm:$0xff]  ;;  %v1149_v38 = vld [vmem:[%s5045_s3 + $0x8] sm:$0xff] }
  0x35   : > { %827 = vmatpush1.msra.mxu0 %v2963_v46  ;;  %2984 = vmatmul.mubr.msk.f32.gmra.mxu1 %vm579_vm2, %v905_v50  ;;  %v1270_v37 = vld [vmem:[%s5046_s4 + $0x10] sm:$0xff]  ;;  %v1269_v39 = vld [vmem:[%s5046_s4 + $0x8] sm:$0xff]  ;;  %v1148_v40 = vld [vmem:[%s5045_s3] sm:$0xff] }
  0x36   : > { %2957 = vmatmul.mubr.msk.f32.gmra.mxu0 %vm579_vm2, %v3660_v12  ;;  %828 = vmatprep.subr.mxu0 %v2962_v47  ;;  %v1283_v12 = vld [vmem:[%s5046_s4 + $0x78] sm:$0xff]  ;;  %v1268_v41 = vld [vmem:[%s5046_s4] sm:$0xff]  ;;  %v1177_v42 = vld [vmem:[%s5045_s3 + $0xe8] sm:$0xff] }
  0x37   : > { %764 = vmatprep.mubr.f32.mxu0 %v3478_v5  ;;  %829 = vmatpush1.msra.mxu0 %v2961_v48  ;;  %v1297_v43 = vld [vmem:[%s5046_s4 + $0xe8] sm:$0xff]  ;;  %v1176_v44 = vld [vmem:[%s5045_s3 + $0xe0] sm:$0xff]  ;;  %v1175_v46 = vld [vmem:[%s5045_s3 + $0xd8] sm:$0xff] }
  0x38   : > { %830 = vmatprep.subr.mxu0 %v2960_v49  ;;  %1192 = vmatprep.subr.mxu1 %v3478_v5  ;;  %v1296_v45 = vld [vmem:[%s5046_s4 + $0xe0] sm:$0xff]  ;;  %v1295_v47 = vld [vmem:[%s5046_s4 + $0xd8] sm:$0xff]  ;;  %v1174_v48 = vld [vmem:[%s5045_s3 + $0xd0] sm:$0xff] }
  0x39   : > { %831 = vmatpush1.msra.mxu0 %v2959_v51  ;;  %1193 = vmatpush1.msra.mxu1 %v1161_v56  ;;  %v1294_v49 = vld [vmem:[%s5046_s4 + $0xd0] sm:$0xff]  ;;  %v1173_v50 = vld [vmem:[%s5045_s3 + $0xc8] sm:$0xff]  ;;  %v1172_v52 = vld [vmem:[%s5045_s3 + $0xc0] sm:$0xff] }
  0x3a   : > { %2958 = vmatmul.mubr.msk.f32.gmra.mxu0 %vm579_vm2, %v3662_v13  ;;  %2993 = vmatprep.subr.msk.mxu0 %vm586_vm0, %v2992_v55  ;;  %v1021_v13 = vrot.slane %v3672_v18, 4  ;;  %v1293_v51 = vld [vmem:[%s5046_s4 + $0xc8] sm:$0xff]  ;;  %v1292_v53 = vld [vmem:[%s5046_s4 + $0xc0] sm:$0xff]  ;;  %v1171_v54 = vld [vmem:[%s5045_s3 + $0xb8] sm:$0xff] }
  0x3b   : > { %864 = vmatprep.mubr.f32.mxu0 %v3478_v5  ;;  %1194 = vmatprep.subr.mxu1 %v3478_v5  ;;  %v1291_v55 = vld [vmem:[%s5046_s4 + $0xb8] sm:$0xff]  ;;  %v1170_v56 = vld [vmem:[%s5045_s3 + $0xb0] sm:$0xff]  ;;  %v1169_v58 = vld [vmem:[%s5045_s3 + $0xa8] sm:$0xff] }
  0x3c   : > { %1195 = vmatpush1.msra.mxu1 %v1160_v59  ;;  %v1022_v18 = vsel %vm586_vm0, %v1019_v11, %v1021_v13  ;;  %v1289_v59 = vld [vmem:[%s5046_s4 + $0xa8] sm:$0xff]  ;;  %v1286_v1 = vld [vmem:[%s5046_s4 + $0x90] sm:$0xff] }
  0x3d   : > { %1196 = vmatprep.subr.mxu1 %v3478_v5 }
  0x3e   : > { %2969 = vmatmul.mubr.msk.f32.vlgmr.msra.gmra.mxu0 %vm579_vm2, %v783_v57  ;;  %1197 = vmatpush1.msra.mxu1 %v1159_v63  ;;  %v1290_v57 = vld [vmem:[%s5046_s4 + $0xb0] sm:$0xff]  ;;  %v1287_v63 = vld [vmem:[%s5046_s4 + $0x98] sm:$0xff] }
  0x3f   : > { %870 = vmatprep.mubr.f32.mxu0 %v3478_v5  ;;  %2994 = vmatpush1.msk.msra.mxu0 %vm586_vm0, %v2991_v60  ;;  %v1168_v60 = vld [vmem:[%s5045_s3 + $0xa0] sm:$0xff] }
  0x40   : > { %1061 = vmatprep.subr.mxu0 %v2990_v61  ;;  %1198 = vmatprep.subr.mxu1 %v3478_v5  ;;  %v1288_v61 = vld [vmem:[%s5046_s4 + $0xa0] sm:$0xff] }
  0x41   : > { %1062 = vmatpush1.msra.mxu0 %v2989_v62  ;;  %1199 = vmatpush1.msra.mxu1 %v1158_v7  ;;  %v1167_v62 = vld [vmem:[%s5045_s3 + $0x98] sm:$0xff] }
  0x42   : > { %2970 = vmatmul.mubr.msk.f32.gmra.mxu0 %vm579_vm2, %v785_v0  ;;  %1063 = vmatprep.subr.mxu0 %v2988_v2  ;;  %v1166_v0 = vld [vmem:[%s5045_s3 + $0x90] sm:$0xff]  ;;  %v1165_v2 = vld [vmem:[%s5045_s3 + $0x88] sm:$0xff] }
  0x43   : > { %876 = vmatprep.mubr.f32.mxu0 %v3478_v5  ;;  %1064 = vmatpush1.msra.mxu0 %v2987_v3  ;;  %v1285_v3 = vld [vmem:[%s5046_s4 + $0x88] sm:$0xff] }
  0x44   : > { %1065 = vmatprep.subr.mxu0 %v2986_v4  ;;  %1200 = vmatprep.subr.mxu1 %v3478_v5  ;;  %v1164_v4 = vld [vmem:[%s5045_s3 + $0x80] sm:$0xff] }
  0x45   : > { %1066 = vmatpush1.msra.mxu0 %v2985_v6  ;;  %1201 = vmatpush1.msra.mxu1 %v1157_v14  ;;  %v1284_v6 = vld [vmem:[%s5046_s4 + $0x80] sm:$0xff] }
  0x46   : > { %2971 = vmatmul.mubr.msk.f32.gmra.mxu0 %vm579_vm2, %v787_v8  ;;  %1298 = vmatprep.subr.mxu0 %v3478_v5 }
  0x47   : > { %1099 = vmatprep.mubr.f32.mxu0 %v3478_v5  ;;  %1202 = vmatprep.subr.mxu1 %v3478_v5 }
  0x48   : > { %1203 = vmatpush1.msra.mxu1 %v1156_v24 }
  0x49   : > { %1204 = vmatprep.subr.mxu1 %v3478_v5 }
  0x4a   : > { %2995 = vmatmul.mubr.msk.f32.vlgmr.msra.gmra.mxu0 %vm579_vm2, %v1018_v15  ;;  %1205 = vmatpush1.msra.mxu1 %v1155_v26 }
  0x4b   : > { %1105 = vmatprep.mubr.f32.mxu0 %v3478_v5  ;;  %1299 = vmatpush1.msra.mxu0 %v1283_v12 }
  0x4c   : > { %1300 = vmatprep.subr.mxu0 %v3478_v5  ;;  %1206 = vmatprep.subr.mxu1 %v3478_v5 }
  0x4d   : > { %1301 = vmatpush1.msra.mxu0 %v1282_v16  ;;  %1207 = vmatpush1.msra.mxu1 %v1154_v28 }
  0x4e   : > { %2996 = vmatmul.mubr.msk.f32.gmra.mxu0 %vm579_vm2, %v1020_v17  ;;  %1302 = vmatprep.subr.mxu0 %v3478_v5 }
  0x4f   : > { %1111 = vmatprep.mubr.f32.mxu0 %v3478_v5  ;;  %1303 = vmatpush1.msra.mxu0 %v1281_v19 }
  0x50   : > { %1304 = vmatprep.subr.mxu0 %v3478_v5  ;;  %1208 = vmatprep.subr.mxu1 %v3478_v5 }
  0x51   : > { %1305 = vmatpush1.msra.mxu0 %v1280_v20  ;;  %1209 = vmatpush1.msra.mxu1 %v1153_v30 }
  0x52   : > { %2997 = vmatmul.mubr.msk.f32.gmra.mxu0 %vm579_vm2, %v1022_v18  ;;  %1306 = vmatprep.subr.mxu0 %v3478_v5 }
  0x53   : > { %1307 = vmatpush1.msra.mxu0 %v1279_v21  ;;  %1210 = vmatprep.subr.mxu1 %v3478_v5  ;;  %v1126_v21 = vlaneseq }
  0x54   : > { %1308 = vmatprep.subr.mxu0 %v3478_v5  ;;  %1211 = vmatpush1.msra.mxu1 %v1152_v32 }
  0x55   : > { %1309 = vmatpush1.msra.mxu0 %v1278_v22  ;;  %1212 = vmatprep.subr.mxu1 %v3478_v5 }
  0x56   : > { %1310 = vmatprep.subr.mxu0 %v3478_v5  ;;  %1213 = vmatpush1.msra.mxu1 %v1151_v34 }
  0x57   : > { %1311 = vmatpush1.msra.mxu0 %v1277_v23  ;;  %1214 = vmatprep.subr.mxu1 %v3478_v5 }
  0x58   : > { %1312 = vmatprep.subr.mxu0 %v3478_v5  ;;  %1215 = vmatpush1.msra.mxu1 %v1150_v36  ;;  %v1124_v36 = vld [vmem:[%s5044_s2] sm:$0x3] }
  0x59   : > { %1313 = vmatpush1.msra.mxu0 %v1276_v25  ;;  %1216 = vmatprep.subr.mxu1 %v3478_v5  ;;  %v4063_v25 = vshrl.u32 %v1126_v21, 7  ;;  %v3034_v21 = vld [vmem:[%s5049_s7 + $0x1c0] sm:$0xff] }
  0x5a   : > { %1314 = vmatprep.subr.mxu0 %v3478_v5  ;;  %1217 = vmatpush1.msra.mxu1 %v1149_v38 }
  0x5b   : > { %1315 = vmatpush1.msra.mxu0 %v1275_v27  ;;  %1218 = vmatprep.subr.mxu1 %v3478_v5  ;;  %v1128_v32 = vsub.s32 0, %v4063_v25 }
  0x5c   : > { %1316 = vmatprep.subr.mxu0 %v3478_v5  ;;  %1219 = vmatpush1.msra.mxu1 %v1148_v40 }
  0x5d   : > { %1317 = vmatpush1.msra.mxu0 %v1274_v29  ;;  %1224 = vmatprep.subr.mxu1 %v3478_v5 }
  0x5e   : > { %1318 = vmatprep.subr.mxu0 %v3478_v5  ;;  %1225 = vmatpush2.msra.mxu1 %v1177_v42 }
  0x5f   : > { %1319 = vmatpush1.msra.mxu0 %v1273_v31  ;;  %1226 = vmatprep.subr.mxu1 %v3478_v5 }
  0x60   : > { %1320 = vmatprep.subr.mxu0 %v3478_v5  ;;  %1227 = vmatpush2.msra.mxu1 %v1176_v44 }
  0x61   : > { %1321 = vmatpush1.msra.mxu0 %v1272_v33  ;;  %1228 = vmatprep.subr.mxu1 %v3478_v5  ;;  %v1132_v33 = vsub.s32 1, %v4063_v25  ;;  %v2536_v25 = vld [vmem:[%s5055_s13 + $0x98] sm:$0xff] }
  0x62   : > { %1322 = vmatprep.subr.mxu0 %v3478_v5  ;;  %1229 = vmatpush2.msra.mxu1 %v1175_v46 }
  0x63   : > { %1323 = vmatpush1.msra.mxu0 %v1271_v35  ;;  %1230 = vmatprep.subr.mxu1 %v3478_v5  ;;  %v1133_v44 = vrot.slane %v1124_v36, %v1132_v33 }
  0x64   : > { %1324 = vmatprep.subr.mxu0 %v3478_v5  ;;  %1231 = vmatpush2.msra.mxu1 %v1174_v48 }
  0x65   : > { %1325 = vmatpush1.msra.mxu0 %v1270_v37  ;;  %1232 = vmatprep.subr.mxu1 %v3478_v5 }
  0x66   : > { %1326 = vmatprep.subr.mxu0 %v3478_v5  ;;  %1233 = vmatpush2.msra.mxu1 %v1173_v50 }
  0x67   : > { %1327 = vmatpush1.msra.mxu0 %v1269_v39  ;;  %1234 = vmatprep.subr.mxu1 %v3478_v5 }
  0x68   : > { %1328 = vmatprep.subr.mxu0 %v3478_v5  ;;  %1235 = vmatpush2.msra.mxu1 %v1172_v52 }
  0x69   : > { %1329 = vmatpush1.msra.mxu0 %v1268_v41  ;;  %1236 = vmatprep.subr.mxu1 %v3478_v5 }
  0x6a   : > { %1334 = vmatprep.subr.mxu0 %v3478_v5  ;;  %1237 = vmatpush2.msra.mxu1 %v1171_v54 }
  0x6b   : > { %1335 = vmatpush2.msra.mxu0 %v1297_v43  ;;  %1238 = vmatprep.subr.mxu1 %v3478_v5  ;;  %v1129_v43 = vrot.slane %v1124_v36, %v1128_v32  ;;  %v3022_v36 = vld [vmem:[%s5049_s7 + $0x160] sm:$0xff] }
  0x6c   : > { %1336 = vmatprep.subr.mxu0 %v3478_v5  ;;  %1239 = vmatpush2.msra.mxu1 %v1170_v56 }
  0x6d   : > { %1337 = vmatpush2.msra.mxu0 %v1296_v45  ;;  %1240 = vmatprep.subr.mxu1 %v3478_v5 }
  0x6e   : > { %1338 = vmatprep.subr.mxu0 %v3478_v5  ;;  %1241 = vmatpush2.msra.mxu1 %v1169_v58 }
  0x6f   : > { %1339 = vmatpush2.msra.mxu0 %v1295_v47  ;;  %1242 = vmatprep.subr.mxu1 %v3478_v5 }
  0x70   : > { %1340 = vmatprep.subr.mxu0 %v3478_v5  ;;  %1243 = vmatpush2.msra.mxu1 %v1168_v60 }
  0x71   : > { %1341 = vmatpush2.msra.mxu0 %v1294_v49  ;;  %1244 = vmatprep.subr.mxu1 %v3478_v5 }
  0x72   : > { %1342 = vmatprep.subr.mxu0 %v3478_v5  ;;  %1245 = vmatpush2.msra.mxu1 %v1167_v62 }
  0x73   : > { %1343 = vmatpush2.msra.mxu0 %v1293_v51  ;;  %1246 = vmatprep.subr.mxu1 %v3478_v5 }
  0x74   : > { %1344 = vmatprep.subr.mxu0 %v3478_v5  ;;  %1247 = vmatpush2.msra.mxu1 %v1166_v0 }
  0x75   : > { %1345 = vmatpush2.msra.mxu0 %v1292_v53  ;;  %1248 = vmatprep.subr.mxu1 %v3478_v5 }
  0x76   : > { %1346 = vmatprep.subr.mxu0 %v3478_v5  ;;  %1249 = vmatpush2.msra.mxu1 %v1165_v2 }
  0x77   : > { %1347 = vmatpush2.msra.mxu0 %v1291_v55  ;;  %1250 = vmatprep.subr.mxu1 %v3478_v5 }
  0x78   : > { %1348 = vmatprep.subr.mxu0 %v3478_v5  ;;  %1251 = vmatpush2.msra.mxu1 %v1164_v4 }
  0x79   : > { %1349 = vmatpush2.msra.mxu0 %v1290_v57 }
  0x7a   : > { %1350 = vmatprep.subr.mxu0 %v3478_v5 }
  0x7b   : > { %1351 = vmatpush2.msra.mxu0 %v1289_v59 }
  0x7c   : > { %1352 = vmatprep.subr.mxu0 %v3478_v5 }
  0x7d   : > { %1353 = vmatpush2.msra.mxu0 %v1288_v61 }
  0x7e   : > { %1354 = vmatprep.subr.mxu0 %v3478_v5 }
  0x7f   : > { %1355 = vmatpush2.msra.mxu0 %v1287_v63 }
  0x80   : > { %1356 = vmatprep.subr.mxu0 %v3478_v5 }
  0x81   : > { %1357 = vmatpush2.msra.mxu0 %v1286_v1 }
  0x82   : > { %1358 = vmatprep.subr.mxu0 %v3478_v5 }
  0x83   : > { %1359 = vmatpush2.msra.mxu0 %v1285_v3 }
  0x84   : > { %1360 = vmatprep.subr.mxu0 %v3478_v5 }
  0x85   : > { %1361 = vmatpush2.msra.mxu0 %v1284_v6 }
  0xe6   : > { %v659_v7 = vpop.f32.mrf.mxu0 }
  0xe8   : > { %v661_v8 = vpop.f32.mrf.mxu0 }
  0xea   : > { %v665_v9 = vpop.f32.mrf.mxu0 }
  0xec   : > { %v667_v10 = vpop.f32.mrf.mxu0 }
  0xed   : > { %v984_v20 = vpop.f32.mrf.mxu1 }
  0xee   : > { %v671_v14 = vpop.f32.mrf.mxu0 }
  0xef   : > { %v986_v23 = vpop.f32.mrf.mxu1 }
  0xf0   : > { %v673_v15 = vpop.f32.mrf.mxu0 }
  0xf1   : > { %v990_v28 = vpop.f32.mrf.mxu1 }
  0xf2   : > { %v754_v11 = vpop.f32.mrf.mxu0 }
  0xf3   : > { %v755_v26 = vadd.f32 %v754_v11, %v659_v7  ;;  %v992_v37 = vpop.f32.mrf.mxu1 }
  0xf4   : > { %v756_v12 = vpop.f32.mrf.mxu0 }
  0xf5   : > { %v757_v29 = vadd.f32 %v756_v12, %v661_v8  ;;  %v996_v49 = vpop.f32.mrf.mxu1 }
  0xf6   : > { %v760_v16 = vpop.f32.mrf.mxu0 }
  0xf7   : > { %v761_v34 = vadd.f32 %v760_v16, %v665_v9  ;;  %v998_v61 = vpop.f32.mrf.mxu1 }
  0xf8   : > { %v762_v17 = vpop.f32.mrf.mxu0 }
  0xf9   : > { %v763_v39 = vadd.f32 %v762_v17, %v667_v10 }
  0xfa   : > { %v766_v13 = vpop.f32.mrf.mxu0 }
  0xfb   : > { %v767_v45 = vadd.f32 %v766_v13, %v671_v14  ;;  %v1381_v13 = vld [vmem:[%s5047_s5] sm:$0xff] }
  0xfc   : > { %v768_v19 = vpop.f32.mrf.mxu0 }
  0xfd   : > { %v769_v51 = vadd.f32 %v768_v19, %v673_v15  ;;  %v3037_v19 = vld [vmem:[%s5049_s7 + $0x1d8] sm:$0xff] }
  0xfe   : > { %v866_v18 = vpop.f32.mrf.mxu0  ;;  %1621 = vmatprep.subr.mxu0 %v3037_v19  ;;  %v1557_v19 = vld [vmem:[%s5049_s7 + $0x38] sm:$0xff] }
  0xff   : > { %v883_v30 = vadd.f32 %v866_v18, %v755_v26  ;;  %v3035_v18 = vld [vmem:[%s5049_s7 + $0x1c8] sm:$0xff]  ;;  %v3030_v26 = vld [vmem:[%s5049_s7 + $0x1a0] sm:$0xff] }
 0x100   : > { %v868_v22 = vpop.f32.mrf.mxu0 }
 0x101   : > { %v884_v35 = vadd.f32 %v868_v22, %v757_v29  ;;  %v1001_v40 = vadd.f32 %v984_v20, %v883_v30  ;;  %v3036_v20 = vld [vmem:[%s5049_s7 + $0x1d0] sm:$0xff]  ;;  %v3033_v22 = vld [vmem:[%s5049_s7 + $0x1b8] sm:$0xff]  ;;  %v3027_v29 = vld [vmem:[%s5049_s7 + $0x188] sm:$0xff] }
 0x102   : > { %v872_v24 = vpop.f32.mrf.mxu0  ;;  %v3026_v30 = vld [vmem:[%s5049_s7 + $0x180] sm:$0xff] }
 0x103   : > { %v885_v41 = vadd.f32 %v872_v24, %v761_v34  ;;  %v1002_v46 = vadd.f32 %v986_v23, %v884_v35  ;;  %v3032_v23 = vld [vmem:[%s5049_s7 + $0x1b0] sm:$0xff]  ;;  %v3031_v24 = vld [vmem:[%s5049_s7 + $0x1a8] sm:$0xff] }
 0x104   : > { %v874_v27 = vpop.f32.mrf.mxu0  ;;  %v3024_v34 = vld [vmem:[%s5049_s7 + $0x170] sm:$0xff]  ;;  %v3023_v35 = vld [vmem:[%s5049_s7 + $0x168] sm:$0xff] }
 0x105   : > { %v886_v47 = vadd.f32 %v874_v27, %v763_v39  ;;  %v1003_v52 = vadd.f32 %v990_v28, %v885_v41  ;;  %v3029_v27 = vld [vmem:[%s5049_s7 + $0x198] sm:$0xff]  ;;  %v3028_v28 = vld [vmem:[%s5049_s7 + $0x190] sm:$0xff]  ;;  %v3019_v39 = vld [vmem:[%s5049_s7 + $0x148] sm:$0xff] }
 0x106   : > { %v878_v31 = vpop.f32.mrf.mxu0 }
 0x107   : > { %v887_v53 = vadd.f32 %v878_v31, %v767_v45  ;;  %v1004_v57 = vadd.f32 %v992_v37, %v886_v47  ;;  %v3025_v31 = vld [vmem:[%s5049_s7 + $0x178] sm:$0xff] }
 0x108   : > { %v880_v38 = vpop.f32.mrf.mxu0  ;;  %v3021_v37 = vld [vmem:[%s5049_s7 + $0x158] sm:$0xff] }
 0x109   : > { %v888_v58 = vadd.f32 %v880_v38, %v769_v51  ;;  %v1005_v63 = vadd.f32 %v996_v49, %v887_v53  ;;  %v3020_v38 = vld [vmem:[%s5049_s7 + $0x150] sm:$0xff] }
 0x10a   : > { %v1101_v42 = vpop.f32.mrf.mxu0 }
 0x10b   : > { %v1118_v48 = vadd.f32 %v1101_v42, %v1001_v40  ;;  %v1006_v6 = vadd.f32 %v998_v61, %v888_v58  ;;  %v1579_v58 = vld [vmem:[%s5049_s7 + $0xe8] sm:$0xff]  ;;  %v1576_v61 = vld [vmem:[%s5049_s7 + $0xd0] sm:$0xff] }
 0x10c   : > { %v1103_v50 = vpop.f32.mrf.mxu0 }
 0x10d   : > { %v1119_v54 = vadd.f32 %v1103_v50, %v1002_v46  ;;  %v1136_v55 = vadd.f32 %v1129_v43, %v1118_v48 }
 0x10e   : > { %v1107_v56 = vpop.f32.mrf.mxu0 }
 0x10f   : > { %v1137_v59 = vadd.f32 %v1133_v44, %v1119_v54  ;;  %v1120_v60 = vadd.f32 %v1107_v56, %v1003_v52  ;;  %v1142_v2 = vmax.f32 %v1136_v55, 0.0  ;;  %v1382_v55 = vld [vmem:[%s5047_s5 + $0x8] sm:$0xf]  ;;  %v1465_v56 = vld [vmem:[%s5048_s6] sm:$0xff] }
 0x110   : > { %v1109_v62 = vpop.f32.mrf.mxu0 }
 0x111   : > { %v1143_v0 = vmax.f32 %v1137_v59, 0.0  ;;  %v1121_v1 = vadd.f32 %v1109_v62, %v1004_v57  ;;  %v1138_v3 = vadd.f32 %v1129_v43, %v1120_v60  ;;  %v1466_v57 = vld [vmem:[%s5048_s6 + $0x8] sm:$0xf]  ;;  %v1578_v59 = vld [vmem:[%s5049_s7 + $0xe0] sm:$0xff]  ;;  %v1577_v60 = vld [vmem:[%s5049_s7 + $0xd8] sm:$0xff] }
 0x112   : > { %v1113_v4 = vpop.f32.mrf.mxu0  ;;  %v1575_v62 = vld [vmem:[%s5049_s7 + $0xc8] sm:$0xff] }
 0x113   : > { %v1139_v7 = vadd.f32 %v1133_v44, %v1121_v1  ;;  %v1122_v8 = vadd.f32 %v1113_v4, %v1005_v63  ;;  %2998 = vmatprep.mubr.msk.f32.mxu1 %vm1178_vm5, %v1143_v0  ;;  %3001 = vmatprep.mubr.msk.f32.mxu0 %vm1178_vm5, %v1143_v0  ;;  %v1144_v15 = vmax.f32 %v1138_v3, 0.0  ;;  %v1574_v63 = vld [vmem:[%s5049_s7 + $0xc0] sm:$0xff]  ;;  %v1573_v0 = vld [vmem:[%s5049_s7 + $0xb8] sm:$0xff]  ;;  %v1572_v1 = vld [vmem:[%s5049_s7 + $0xb0] sm:$0xff] }
 0x114   : > { %v1115_v9 = vpop.f32.mrf.mxu0  ;;  %1253 = vmatmul.mubr.f32.vlgmr.msra.gmra.mxu1 %v1142_v2  ;;  %1363 = vmatmul.mubr.f32.vlgmr.msra.gmra.mxu0 %v1142_v2  ;;  %v1571_v2 = vld [vmem:[%s5049_s7 + $0xa8] sm:$0xff]  ;;  %v1570_v3 = vld [vmem:[%s5049_s7 + $0xa0] sm:$0xff]  ;;  %v1569_v4 = vld [vmem:[%s5049_s7 + $0x98] sm:$0xff] }
 0x115   : > { %v1145_v10 = vmax.f32 %v1139_v7, 0.0  ;;  %v1123_v14 = vadd.f32 %v1115_v9, %v1006_v6  ;;  %v1140_v11 = vadd.f32 %v1129_v43, %v1122_v8  ;;  %1622 = vmatpush1.msra.mxu0 %v3036_v20  ;;  %v1568_v6 = vld [vmem:[%s5049_s7 + $0x90] sm:$0xff]  ;;  %v1567_v7 = vld [vmem:[%s5049_s7 + $0x88] sm:$0xff]  ;;  %v1566_v8 = vld [vmem:[%s5049_s7 + $0x80] sm:$0xff] }
 0x116   : > { %1623 = vmatprep.subr.mxu0 %v3035_v18  ;;  %v1565_v9 = vld [vmem:[%s5049_s7 + $0x78] sm:$0xff]  ;;  %v1556_v18 = vld [vmem:[%s5049_s7 + $0x30] sm:$0xff] }
 0x117   : > { %v1141_v12 = vadd.f32 %v1133_v44, %v1123_v14  ;;  %2999 = vmatprep.mubr.msk.f32.mxu1 %vm1178_vm5, %v1145_v10  ;;  %3002 = vmatprep.mubr.msk.f32.mxu0 %vm1178_vm5, %v1145_v10  ;;  %v1146_v17 = vmax.f32 %v1140_v11, 0.0  ;;  %v1564_v10 = vld [vmem:[%s5049_s7 + $0x70] sm:$0xff]  ;;  %v1563_v14 = vld [vmem:[%s5049_s7 + $0x68] sm:$0xff]  ;;  %v1561_v11 = vld [vmem:[%s5049_s7 + $0x58] sm:$0xff] }
 0x118   : > { %1258 = vmatmul.mubr.f32.gmra.mxu1 %v1144_v15  ;;  %1368 = vmatmul.mubr.f32.gmra.mxu0 %v1144_v15  ;;  %v1562_v15 = vld [vmem:[%s5049_s7 + $0x60] sm:$0xff]  ;;  %v3017_v20 = vld [vmem:[%s5049_s7 + $0x138] sm:$0xff] }
 0x119   : > { %v1147_v16 = vmax.f32 %v1141_v12, 0.0  ;;  %1624 = vmatpush1.msra.mxu0 %v3034_v21  ;;  %v1560_v12 = vld [vmem:[%s5049_s7 + $0x50] sm:$0xff] }
 0x11a   : > { %1625 = vmatprep.subr.mxu0 %v3033_v22  ;;  %v3016_v21 = vld [vmem:[%s5049_s7 + $0x130] sm:$0xff]  ;;  %v1555_v22 = vld [vmem:[%s5049_s7 + $0x28] sm:$0xff] }
 0x11b   : > { %3000 = vmatprep.mubr.msk.f32.mxu1 %vm1178_vm5, %v1147_v16  ;;  %3003 = vmatprep.mubr.msk.f32.mxu0 %vm1178_vm5, %v1147_v16  ;;  %v1559_v16 = vld [vmem:[%s5049_s7 + $0x48] sm:$0xff] }
 0x11c   : > { %1263 = vmatmul.mubr.f32.gmra.mxu1 %v1146_v17  ;;  %1373 = vmatmul.mubr.f32.gmra.mxu0 %v1146_v17  ;;  %v1558_v17 = vld [vmem:[%s5049_s7 + $0x40] sm:$0xff] }
 0x11d   : > { %1683 = vmatprep.mubr.f32.mxu0 %v3478_v5  ;;  %3226 = vmatprep.mubr.msk.f32.mxu1 %vm1383_vm6, %v1381_v13  ;;  %v3018_v13 = vld [vmem:[%s5049_s7 + $0x140] sm:$0xff] }
 0x11e   : > { %1626 = vmatpush1.msra.mxu0 %v3032_v23  ;;  %v3015_v23 = vld [vmem:[%s5049_s7 + $0x128] sm:$0xff] }
 0x11f   : > { %1627 = vmatprep.subr.mxu0 %v3031_v24  ;;  %v1554_v24 = vld [vmem:[%s5049_s7 + $0x20] sm:$0xff] }
 0x120   : > { %1628 = vmatpush1.msra.mxu0 %v3030_v26  ;;  %v3014_v26 = vld [vmem:[%s5049_s7 + $0x120] sm:$0xff] }
 0x121   : > { %1629 = vmatprep.subr.mxu0 %v3029_v27  ;;  %v1553_v27 = vld [vmem:[%s5049_s7 + $0x18] sm:$0xff] }
 0x122   : > { %1630 = vmatpush1.msra.mxu0 %v3028_v28  ;;  %v3013_v28 = vld [vmem:[%s5049_s7 + $0x118] sm:$0xff] }
 0x123   : > { %1631 = vmatprep.subr.mxu0 %v3027_v29  ;;  %v1552_v29 = vld [vmem:[%s5049_s7 + $0x10] sm:$0xff] }
 0x124   : > { %1632 = vmatpush1.msra.mxu0 %v3026_v30  ;;  %v3012_v30 = vld [vmem:[%s5049_s7 + $0x110] sm:$0xff] }
 0x125   : > { %1633 = vmatprep.subr.mxu0 %v3025_v31  ;;  %v1551_v31 = vld [vmem:[%s5049_s7 + $0x8] sm:$0xff] }
 0x126   : > { %1634 = vmatpush1.msra.mxu0 %v3024_v34  ;;  %v3011_v34 = vld [vmem:[%s5049_s7 + $0x108] sm:$0xff] }
 0x127   : > { %1635 = vmatprep.subr.mxu0 %v3023_v35  ;;  %v1550_v35 = vld [vmem:[%s5049_s7] sm:$0xff] }
 0x128   : > { %1636 = vmatpush1.msra.mxu0 %v3022_v36  ;;  %v3010_v36 = vld [vmem:[%s5049_s7 + $0x100] sm:$0xff] }
 0x129   : > { %1637 = vmatprep.subr.mxu0 %v3021_v37  ;;  %v3100_v37 = vld [vmem:[%s5049_s7 + $0x3b8] sm:$0xff] }
 0x12a   : > { %1638 = vmatpush1.msra.mxu0 %v3020_v38  ;;  %v3009_v38 = vld [vmem:[%s5049_s7 + $0xf8] sm:$0xff] }
 0x12b   : > { %1639 = vmatprep.subr.mxu0 %v3019_v39  ;;  %v3008_v39 = vld [vmem:[%s5049_s7 + $0xf0] sm:$0xff] }
 0x12c   : > { %1640 = vmatpush1.msra.mxu0 %v3018_v13  ;;  %v3083_v13 = vld [vmem:[%s5049_s7 + $0x330] sm:$0xff] }
 0x12d   : > { %1641 = vmatprep.subr.mxu0 %v3017_v20  ;;  %v3082_v20 = vld [vmem:[%s5049_s7 + $0x328] sm:$0xff] }
 0x12e   : > { %1642 = vmatpush1.msra.mxu0 %v3016_v21  ;;  %v3081_v21 = vld [vmem:[%s5049_s7 + $0x320] sm:$0xff] }
 0x12f   : > { %1643 = vmatprep.subr.mxu0 %v3015_v23  ;;  %v3080_v23 = vld [vmem:[%s5049_s7 + $0x318] sm:$0xff] }
 0x130   : > { %1644 = vmatpush1.msra.mxu0 %v3014_v26  ;;  %v3079_v26 = vld [vmem:[%s5049_s7 + $0x310] sm:$0xff] }
 0x131   : > { %1645 = vmatprep.subr.mxu0 %v3013_v28  ;;  %v3078_v28 = vld [vmem:[%s5049_s7 + $0x308] sm:$0xff] }
 0x132   : > { %1646 = vmatpush1.msra.mxu0 %v3012_v30  ;;  %v3077_v30 = vld [vmem:[%s5049_s7 + $0x300] sm:$0xff] }
 0x133   : > { %1647 = vmatprep.subr.mxu0 %v3011_v34  ;;  %v3076_v34 = vld [vmem:[%s5049_s7 + $0x2f8] sm:$0xff] }
 0x134   : > { %1648 = vmatpush1.msra.mxu0 %v3010_v36  ;;  %v3075_v36 = vld [vmem:[%s5049_s7 + $0x2f0] sm:$0xff] }
 0x135   : > { %1649 = vmatprep.subr.mxu0 %v3009_v38  ;;  %v3074_v38 = vld [vmem:[%s5049_s7 + $0x2e8] sm:$0xff] }
 0x136   : > { %1650 = vmatpush1.msra.mxu0 %v3008_v39  ;;  %v3045_v39 = vld [vmem:[%s5049_s7 + $0x208] sm:$0xff] }
 0x1d4   : > { %v1254_v40 = vpop.f32.mrf.mxu1  ;;  %v1364_v41 = vpop.f32.mrf.mxu0 }
 0x1d5   : > { %v1378_v54 = vmax.f32 %v1254_v40, %v1364_v41  ;;  %v3069_v40 = vld [vmem:[%s5049_s7 + $0x2c8] sm:$0xff] }
 0x1d6   : > { %v1256_v42 = vpop.f32.mrf.mxu1  ;;  %v1366_v43 = vpop.f32.mrf.mxu0  ;;  %1801 = vmatprep.subr.mxu0 %v3069_v40  ;;  %v3073_v40 = vld [vmem:[%s5049_s7 + $0x2e0] sm:$0xff] }
 0x1d8   : > { %v1259_v44 = vpop.f32.mrf.mxu1  ;;  %v1369_v45 = vpop.f32.mrf.mxu0 }
 0x1d9   : > { %v1379_v53 = vmax.f32 %v1259_v44, %v1369_v45 }
 0x1da   : > { %v1261_v46 = vpop.f32.mrf.mxu1  ;;  %v1371_v47 = vpop.f32.mrf.mxu0 }
 0x1db   : > { %v3099_v47 = vld [vmem:[%s5049_s7 + $0x3b0] sm:$0xff] }
 0x1dc   : > { %v1264_v48 = vpop.f32.mrf.mxu1  ;;  %v1374_v49 = vpop.f32.mrf.mxu0 }
 0x1dd   : > { %v1380_v50 = vmax.f32 %v1264_v48, %v1374_v49  ;;  %v3098_v48 = vld [vmem:[%s5049_s7 + $0x3a8] sm:$0xff] }
 0x1de   : > { %v1266_v51 = vpop.f32.mrf.mxu1  ;;  %v1376_v52 = vpop.f32.mrf.mxu0 }
 0x1df   : > { %3220 = vmatprep.subr.mxu1 %v1380_v50  ;;  %v3068_v52 = vld [vmem:[%s5049_s7 + $0x2c0] sm:$0xff] }
 0x1e0   : > { %3221 = vmatpush3.msra.mxu1 %v1380_v50 }
 0x1e1   : > { %3222 = vmatprep.subr.mxu1 %v1379_v53 }
 0x1e2   : > { %3223 = vmatpush3.msra.mxu1 %v1379_v53 }
 0x1e3   : > { %3224 = vmatprep.subr.mxu1 %v1378_v54 }
 0x1e4   : > { %3225 = vmatpush3.msra.mxu1 %v1378_v54 }
 0x1e5   : > { %3229 = vmatprep.subr.mxu1 %v1380_v50  ;;  %3227 = vmatmul.mubr.msk.f32.vlgmr.msra.gmra.mxu1 %vm1383_vm6, %v1382_v55  ;;  %v3067_v55 = vld [vmem:[%s5049_s7 + $0x2b8] sm:$0xff] }
 0x1e6   : > { %3230 = vmatpush3.msra.mxu1 %v1380_v50  ;;  %3235 = vmatprep.mubr.msk.f32.mxu1 %vm1383_vm6, %v1465_v56  ;;  %v3097_v50 = vld [vmem:[%s5049_s7 + $0x3a0] sm:$0xff]  ;;  %v3095_v56 = vld [vmem:[%s5049_s7 + $0x390] sm:$0xff] }
 0x1e7   : > { %3231 = vmatprep.subr.mxu1 %v1379_v53 }
 0x1e8   : > { %3232 = vmatpush3.msra.mxu1 %v1379_v53  ;;  %v3096_v53 = vld [vmem:[%s5049_s7 + $0x398] sm:$0xff] }
 0x1e9   : > { %3233 = vmatprep.subr.mxu1 %v1378_v54 }
 0x1ea   : > { %3234 = vmatpush3.msra.mxu1 %v1378_v54 }
 0x1eb   : > { %3236 = vmatmul.mubr.msk.f32.vlgmr.msra.gmra.mxu1 %vm1383_vm6, %v1466_v57  ;;  %1694 = vmatprep.subr.mxu1 %v1579_v58  ;;  %v3066_v57 = vld [vmem:[%s5049_s7 + $0x2b0] sm:$0xff]  ;;  %v3094_v58 = vld [vmem:[%s5049_s7 + $0x388] sm:$0xff] }
 0x1ec   : > { %1695 = vmatpush1.msra.mxu1 %v1578_v59  ;;  %1756 = vmatprep.mubr.f32.mxu1 %v3478_v5  ;;  %v3065_v59 = vld [vmem:[%s5049_s7 + $0x2a8] sm:$0xff] }
 0x1ed   : > { %1696 = vmatprep.subr.mxu1 %v1577_v60  ;;  %v3093_v60 = vld [vmem:[%s5049_s7 + $0x380] sm:$0xff] }
 0x1ee   : > { %1697 = vmatpush1.msra.mxu1 %v1576_v61  ;;  %v3064_v61 = vld [vmem:[%s5049_s7 + $0x2a0] sm:$0xff] }
 0x1ef   : > { %1698 = vmatprep.subr.mxu1 %v1575_v62  ;;  %v3092_v62 = vld [vmem:[%s5049_s7 + $0x378] sm:$0xff] }
 0x1f0   : > { %1699 = vmatpush1.msra.mxu1 %v1574_v63  ;;  %v3063_v63 = vld [vmem:[%s5049_s7 + $0x298] sm:$0xff] }
 0x1f1   : > { %1700 = vmatprep.subr.mxu1 %v1573_v0  ;;  %v3091_v0 = vld [vmem:[%s5049_s7 + $0x370] sm:$0xff] }
 0x1f2   : > { %1701 = vmatpush1.msra.mxu1 %v1572_v1  ;;  %v3062_v1 = vld [vmem:[%s5049_s7 + $0x290] sm:$0xff] }
 0x1f3   : > { %1702 = vmatprep.subr.mxu1 %v1571_v2  ;;  %v3090_v2 = vld [vmem:[%s5049_s7 + $0x368] sm:$0xff] }
 0x1f4   : > { %1703 = vmatpush1.msra.mxu1 %v1570_v3  ;;  %v3061_v3 = vld [vmem:[%s5049_s7 + $0x288] sm:$0xff] }
 0x1f5   : > { %1704 = vmatprep.subr.mxu1 %v1569_v4  ;;  %v3089_v4 = vld [vmem:[%s5049_s7 + $0x360] sm:$0xff] }
 0x1f6   : > { %1705 = vmatpush1.msra.mxu1 %v1568_v6  ;;  %v3060_v6 = vld [vmem:[%s5049_s7 + $0x280] sm:$0xff] }
 0x1f7   : > { %1706 = vmatprep.subr.mxu1 %v1567_v7  ;;  %v3088_v7 = vld [vmem:[%s5049_s7 + $0x358] sm:$0xff] }
 0x1f8   : > { %1707 = vmatpush1.msra.mxu1 %v1566_v8  ;;  %v3059_v8 = vld [vmem:[%s5049_s7 + $0x278] sm:$0xff] }
 0x1f9   : > { %1708 = vmatprep.subr.mxu1 %v1565_v9  ;;  %v3087_v9 = vld [vmem:[%s5049_s7 + $0x350] sm:$0xff] }
 0x1fa   : > { %1709 = vmatpush1.msra.mxu1 %v1564_v10  ;;  %v3058_v10 = vld [vmem:[%s5049_s7 + $0x270] sm:$0xff] }
 0x1fb   : > { %1710 = vmatprep.subr.mxu1 %v1563_v14  ;;  %v3086_v14 = vld [vmem:[%s5049_s7 + $0x348] sm:$0xff] }
 0x1fc   : > { %1711 = vmatpush1.msra.mxu1 %v1562_v15  ;;  %v3057_v15 = vld [vmem:[%s5049_s7 + $0x268] sm:$0xff] }
 0x1fd   : > { %1712 = vmatprep.subr.mxu1 %v1561_v11  ;;  %v3085_v11 = vld [vmem:[%s5049_s7 + $0x340] sm:$0xff] }
 0x1fe   : > { %1713 = vmatpush1.msra.mxu1 %v1560_v12  ;;  %v3056_v12 = vld [vmem:[%s5049_s7 + $0x260] sm:$0xff] }
 0x1ff   : > { %1714 = vmatprep.subr.mxu1 %v1559_v16  ;;  %v3084_v16 = vld [vmem:[%s5049_s7 + $0x338] sm:$0xff] }
 0x200   : > { %1715 = vmatpush1.msra.mxu1 %v1558_v17  ;;  %v3055_v17 = vld [vmem:[%s5049_s7 + $0x258] sm:$0xff] }
 0x201   : > { %1716 = vmatprep.subr.mxu1 %v1557_v19  ;;  %v3054_v19 = vld [vmem:[%s5049_s7 + $0x250] sm:$0xff] }
 0x202   : > { %1717 = vmatpush1.msra.mxu1 %v1556_v18  ;;  %v3053_v18 = vld [vmem:[%s5049_s7 + $0x248] sm:$0xff] }
 0x203   : > { %1718 = vmatprep.subr.mxu1 %v1555_v22  ;;  %v3052_v22 = vld [vmem:[%s5049_s7 + $0x240] sm:$0xff] }
 0x204   : > { %1719 = vmatpush1.msra.mxu1 %v1554_v24  ;;  %v3051_v24 = vld [vmem:[%s5049_s7 + $0x238] sm:$0xff] }
 0x205   : > { %1720 = vmatprep.subr.mxu1 %v1553_v27  ;;  %v3050_v27 = vld [vmem:[%s5049_s7 + $0x230] sm:$0xff] }
 0x206   : > { %1721 = vmatpush1.msra.mxu1 %v1552_v29  ;;  %v3049_v29 = vld [vmem:[%s5049_s7 + $0x228] sm:$0xff] }
 0x207   : > { %1722 = vmatprep.subr.mxu1 %v1551_v31  ;;  %v3048_v31 = vld [vmem:[%s5049_s7 + $0x220] sm:$0xff] }
 0x208   : > { %1723 = vmatpush1.msra.mxu1 %v1550_v35  ;;  %v3047_v35 = vld [vmem:[%s5049_s7 + $0x218] sm:$0xff] }
 0x209   : > { %1910 = vmatprep.subr.mxu1 %v3100_v37  ;;  %v3046_v37 = vld [vmem:[%s5049_s7 + $0x210] sm:$0xff] }
 0x2a5   : > { %v3228_v41 = vpop.f32.mrf.mxu1 }
 0x2a7   : > { %v1456_v42 = vpop.f32.mrf.mxu1 }
 0x2ab   : > { %v3237_v43 = vpop.f32.mrf.mxu1 }
 0x2ac   : > { %v4284_v44 = vmax.f32 %v3228_v41, %v3237_v43  ;;  %v3044_v41 = vld [vmem:[%s5049_s7 + $0x200] sm:$0xff] }
 0x2ad   : > { %v1539_v45 = vpop.f32.mrf.mxu1 }
 0x2ae   : > { %v4286_v46 = vmax.f32 %v1456_v42, %v1539_v45  ;;  %v1614_v49 = vrot.slane %v4284_v44, 1  ;;  %v3072_v42 = vld [vmem:[%s5049_s7 + $0x2d8] sm:$0xff] }
 0x2af   : > { %v3043_v45 = vld [vmem:[%s5049_s7 + $0x1f8] sm:$0xff] }
 0x2b0   : > { %3039 = vmatmul.mubr.msk.f32.vlgmr.msra.gmra.mxu1 %vm1616_vm7, %v4286_v46  ;;  %v1613_v51 = vrot.slane %v4286_v46, 1  ;;  %v1903_v43 = vrot.slane %v4286_v46, 3 }
 0x2b1   : > { %1911 = vmatpush1.msra.mxu1 %v3099_v47  ;;  %1972 = vmatprep.mubr.f32.mxu1 %v3478_v5  ;;  %v3071_v47 = vld [vmem:[%s5049_s7 + $0x2d0] sm:$0xff] }
 0x2b2   : > { %1912 = vmatprep.subr.mxu1 %v3098_v48  ;;  %v1615_v54 = vsel %vm571_vm1, %v1613_v51, %v1614_v49  ;;  %v1904_v48 = vrot.slane %v4284_v44, 3  ;;  %v3042_v49 = vld [vmem:[%s5049_s7 + $0x1f0] sm:$0xff]  ;;  %v1794_v51 = vrot.slane %v4286_v46, 2 }
 0x2b3   : > { %1913 = vmatpush1.msra.mxu1 %v3097_v50  ;;  %3038 = vmatmul.mubr.msk.f32.vlgmr.msra.gmra.mxu0 %vm1616_vm7, %v1615_v54  ;;  %v3041_v50 = vld [vmem:[%s5049_s7 + $0x1e8] sm:$0xff]  ;;  %v1795_v54 = vrot.slane %v4284_v44, 2 }
 0x2b4   : > { %1802 = vmatpush1.msra.mxu0 %v3068_v52  ;;  %1914 = vmatprep.subr.mxu1 %v3096_v53  ;;  %v1905_v52 = vsel %vm898_vm3, %v1903_v43, %v1904_v48  ;;  %v3040_v53 = vld [vmem:[%s5049_s7 + $0x1e0] sm:$0xff]  ;;  %v2113_v43 = vld [vmem:[%s5051_s9 + $0x38] sm:$0xff]  ;;  %v2206_v48 = vld [vmem:[%s5052_s10 + $0x30] sm:$0xff] }
 0x2b5   : > { %1803 = vmatprep.subr.mxu0 %v3067_v55  ;;  %1915 = vmatpush1.msra.mxu1 %v3095_v56  ;;  %v3131_v55 = vld [vmem:[%s5049_s7 + $0x4a8] sm:$0xff]  ;;  %v3130_v56 = vld [vmem:[%s5049_s7 + $0x4a0] sm:$0xff] }
 0x2b6   : > { %1804 = vmatpush1.msra.mxu0 %v3066_v57  ;;  %1916 = vmatprep.subr.mxu1 %v3094_v58  ;;  %v1796_v57 = vsel %vm780_vm4, %v1794_v51, %v1795_v54  ;;  %v3129_v58 = vld [vmem:[%s5049_s7 + $0x498] sm:$0xff]  ;;  %v2110_v51 = vld [vmem:[%s5051_s9 + $0x20] sm:$0xff] }
 0x2b7   : > { %1805 = vmatprep.subr.mxu0 %v3065_v59  ;;  %1917 = vmatpush1.msra.mxu1 %v3093_v60  ;;  %v3128_v59 = vld [vmem:[%s5049_s7 + $0x490] sm:$0xff]  ;;  %v3127_v60 = vld [vmem:[%s5049_s7 + $0x488] sm:$0xff]  ;;  %v2203_v54 = vld [vmem:[%s5052_s10 + $0x18] sm:$0xff] }
 0x2b8   : > { %1806 = vmatpush1.msra.mxu0 %v3064_v61  ;;  %1918 = vmatprep.subr.mxu1 %v3092_v62  ;;  %v3126_v61 = vld [vmem:[%s5049_s7 + $0x480] sm:$0xff]  ;;  %v3125_v62 = vld [vmem:[%s5049_s7 + $0x478] sm:$0xff] }
 0x2b9   : > { %1807 = vmatprep.subr.mxu0 %v3063_v63  ;;  %1919 = vmatpush1.msra.mxu1 %v3091_v0  ;;  %v3124_v63 = vld [vmem:[%s5049_s7 + $0x470] sm:$0xff]  ;;  %v3123_v0 = vld [vmem:[%s5049_s7 + $0x468] sm:$0xff] }
 0x2ba   : > { %1808 = vmatpush1.msra.mxu0 %v3062_v1  ;;  %1920 = vmatprep.subr.mxu1 %v3090_v2  ;;  %v3122_v1 = vld [vmem:[%s5049_s7 + $0x460] sm:$0xff]  ;;  %v3121_v2 = vld [vmem:[%s5049_s7 + $0x458] sm:$0xff] }
 0x2bb   : > { %1809 = vmatprep.subr.mxu0 %v3061_v3  ;;  %1921 = vmatpush1.msra.mxu1 %v3089_v4  ;;  %v3120_v3 = vld [vmem:[%s5049_s7 + $0x450] sm:$0xff]  ;;  %v3119_v4 = vld [vmem:[%s5049_s7 + $0x448] sm:$0xff] }
 0x2bc   : > { %1810 = vmatpush1.msra.mxu0 %v3060_v6  ;;  %1922 = vmatprep.subr.mxu1 %v3088_v7  ;;  %v3118_v6 = vld [vmem:[%s5049_s7 + $0x440] sm:$0xff]  ;;  %v3117_v7 = vld [vmem:[%s5049_s7 + $0x438] sm:$0xff] }
 0x2bd   : > { %1811 = vmatprep.subr.mxu0 %v3059_v8  ;;  %1923 = vmatpush1.msra.mxu1 %v3087_v9  ;;  %v3116_v8 = vld [vmem:[%s5049_s7 + $0x430] sm:$0xff]  ;;  %v3115_v9 = vld [vmem:[%s5049_s7 + $0x428] sm:$0xff] }
 0x2be   : > { %1812 = vmatpush1.msra.mxu0 %v3058_v10  ;;  %1924 = vmatprep.subr.mxu1 %v3086_v14  ;;  %v3114_v10 = vld [vmem:[%s5049_s7 + $0x420] sm:$0xff]  ;;  %v3113_v14 = vld [vmem:[%s5049_s7 + $0x418] sm:$0xff] }
 0x2bf   : > { %1813 = vmatprep.subr.mxu0 %v3057_v15  ;;  %1925 = vmatpush1.msra.mxu1 %v3085_v11  ;;  %v3112_v15 = vld [vmem:[%s5049_s7 + $0x410] sm:$0xff]  ;;  %v3111_v11 = vld [vmem:[%s5049_s7 + $0x408] sm:$0xff] }
 0x2c0   : > { %1814 = vmatpush1.msra.mxu0 %v3056_v12  ;;  %1926 = vmatprep.subr.mxu1 %v3084_v16  ;;  %v3110_v12 = vld [vmem:[%s5049_s7 + $0x400] sm:$0xff]  ;;  %v3109_v16 = vld [vmem:[%s5049_s7 + $0x3f8] sm:$0xff] }
 0x2c1   : > { %1815 = vmatprep.subr.mxu0 %v3055_v17  ;;  %1927 = vmatpush1.msra.mxu1 %v3083_v13  ;;  %v3108_v17 = vld [vmem:[%s5049_s7 + $0x3f0] sm:$0xff]  ;;  %v3107_v13 = vld [vmem:[%s5049_s7 + $0x3e8] sm:$0xff] }
 0x2c2   : > { %1816 = vmatpush1.msra.mxu0 %v3054_v19  ;;  %1928 = vmatprep.subr.mxu1 %v3082_v20  ;;  %v3106_v19 = vld [vmem:[%s5049_s7 + $0x3e0] sm:$0xff]  ;;  %v3105_v20 = vld [vmem:[%s5049_s7 + $0x3d8] sm:$0xff] }
 0x2c3   : > { %1817 = vmatprep.subr.mxu0 %v3053_v18  ;;  %1929 = vmatpush1.msra.mxu1 %v3081_v21  ;;  %v3104_v18 = vld [vmem:[%s5049_s7 + $0x3d0] sm:$0xff]  ;;  %v3103_v21 = vld [vmem:[%s5049_s7 + $0x3c8] sm:$0xff] }
 0x2c4   : > { %1818 = vmatpush1.msra.mxu0 %v3052_v22  ;;  %1930 = vmatprep.subr.mxu1 %v3080_v23  ;;  %v2012_v22 = vrot.slane %v4286_v46, 4  ;;  %v3102_v23 = vld [vmem:[%s5049_s7 + $0x3c0] sm:$0xff]  ;;  %v2121_v46 = vld [vmem:[%s5051_s9 + $0x78] sm:$0xff] }
 0x2c5   : > { %1819 = vmatprep.subr.mxu0 %v3051_v24  ;;  %1931 = vmatpush1.msra.mxu1 %v3079_v26  ;;  %v2013_v24 = vrot.slane %v4284_v44, 4  ;;  %v2120_v44 = vld [vmem:[%s5051_s9 + $0x70] sm:$0xff] }
 0x2c6   : > { %1820 = vmatpush1.msra.mxu0 %v3050_v27  ;;  %1932 = vmatprep.subr.mxu1 %v3078_v28  ;;  %v2215_v27 = vld [vmem:[%s5052_s10 + $0x78] sm:$0xff]  ;;  %v2214_v28 = vld [vmem:[%s5052_s10 + $0x70] sm:$0xff] }
 0x2c7   : > { %1821 = vmatprep.subr.mxu0 %v3049_v29  ;;  %1933 = vmatpush1.msra.mxu1 %v3077_v30  ;;  %v2014_v26 = vsel %vm586_vm0, %v2012_v22, %v2013_v24  ;;  %v2119_v29 = vld [vmem:[%s5051_s9 + $0x68] sm:$0xff] }
 0x2c8   : > { %1822 = vmatpush1.msra.mxu0 %v3048_v31  ;;  %1934 = vmatprep.subr.mxu1 %v3076_v34  ;;  %v2213_v30 = vld [vmem:[%s5052_s10 + $0x68] sm:$0xff]  ;;  %v2118_v31 = vld [vmem:[%s5051_s9 + $0x60] sm:$0xff] }
 0x2c9   : > { %1823 = vmatprep.subr.mxu0 %v3047_v35  ;;  %1935 = vmatpush1.msra.mxu1 %v3075_v36  ;;  %v2212_v34 = vld [vmem:[%s5052_s10 + $0x60] sm:$0xff]  ;;  %v2117_v35 = vld [vmem:[%s5051_s9 + $0x58] sm:$0xff] }
 0x2ca   : > { %1824 = vmatpush1.msra.mxu0 %v3046_v37  ;;  %1936 = vmatprep.subr.mxu1 %v3074_v38  ;;  %v2211_v36 = vld [vmem:[%s5052_s10 + $0x58] sm:$0xff]  ;;  %v2116_v37 = vld [vmem:[%s5051_s9 + $0x50] sm:$0xff] }
 0x2cb   : > { %1825 = vmatprep.subr.mxu0 %v3045_v39  ;;  %1937 = vmatpush1.msra.mxu1 %v3073_v40  ;;  %v2210_v38 = vld [vmem:[%s5052_s10 + $0x50] sm:$0xff]  ;;  %v2115_v39 = vld [vmem:[%s5051_s9 + $0x48] sm:$0xff] }
 0x2cc   : > { %1826 = vmatpush1.msra.mxu0 %v3044_v41  ;;  %1938 = vmatprep.subr.mxu1 %v3072_v42  ;;  %v2209_v40 = vld [vmem:[%s5052_s10 + $0x48] sm:$0xff]  ;;  %v2114_v41 = vld [vmem:[%s5051_s9 + $0x40] sm:$0xff] }
 0x2cd   : > { %1827 = vmatprep.subr.mxu0 %v3043_v45  ;;  %1939 = vmatpush1.msra.mxu1 %v3071_v47  ;;  %v2208_v42 = vld [vmem:[%s5052_s10 + $0x40] sm:$0xff]  ;;  %v2207_v45 = vld [vmem:[%s5052_s10 + $0x38] sm:$0xff]  ;;  %v2112_v47 = vld [vmem:[%s5051_s9 + $0x30] sm:$0xff] }
 0x2ce   : > { %1828 = vmatpush1.msra.mxu0 %v3042_v49  ;;  %3101 = vmatmul.mubr.msk.f32.vlgmr.msra.gmra.mxu1 %vm1616_vm7, %v1905_v52  ;;  %v2111_v49 = vld [vmem:[%s5051_s9 + $0x28] sm:$0xff]  ;;  %v2204_v52 = vld [vmem:[%s5052_s10 + $0x20] sm:$0xff] }
 0x2cf   : > { %1829 = vmatprep.subr.mxu0 %v3041_v50  ;;  %1863 = vmatprep.mubr.f32.mxu0 %v3478_v5  ;;  %v2205_v50 = vld [vmem:[%s5052_s10 + $0x28] sm:$0xff] }
 0x2d0   : > { %1830 = vmatpush1.msra.mxu0 %v3040_v53  ;;  %2130 = vmatprep.subr.mxu1 %v3478_v5  ;;  %v2109_v53 = vld [vmem:[%s5051_s9 + $0x18] sm:$0xff] }
 0x2d1   : > { %3070 = vmatmul.mubr.msk.f32.vlgmr.msra.gmra.mxu0 %vm1616_vm7, %v1796_v57  ;;  %2019 = vmatprep.subr.mxu0 %v3131_v55  ;;  %v2108_v55 = vld [vmem:[%s5051_s9 + $0x10] sm:$0xff]  ;;  %v2107_v57 = vld [vmem:[%s5051_s9 + $0x8] sm:$0xff] }
 0x2d2   : > { %2020 = vmatpush1.msra.mxu0 %v3130_v56  ;;  %2081 = vmatprep.mubr.f32.mxu0 %v3478_v5  ;;  %v2202_v56 = vld [vmem:[%s5052_s10 + $0x10] sm:$0xff] }
 0x2d3   : > { %2021 = vmatprep.subr.mxu0 %v3129_v58  ;;  %2131 = vmatpush1.msra.mxu1 %v2121_v46  ;;  %v2201_v58 = vld [vmem:[%s5052_s10 + $0x8] sm:$0xff] }
 0x2d4   : > { %2022 = vmatpush1.msra.mxu0 %v3128_v59  ;;  %2132 = vmatprep.subr.mxu1 %v3478_v5  ;;  %v2106_v59 = vld [vmem:[%s5051_s9] sm:$0xff] }
 0x2d5   : > { %2023 = vmatprep.subr.mxu0 %v3127_v60  ;;  %2133 = vmatpush1.msra.mxu1 %v2120_v44  ;;  %v2200_v60 = vld [vmem:[%s5052_s10] sm:$0xff] }
 0x2d6   : > { %2024 = vmatpush1.msra.mxu0 %v3126_v61  ;;  %2134 = vmatprep.subr.mxu1 %v3478_v5  ;;  %v2125_v61 = vld [vmem:[%s5051_s9 + $0x98] sm:$0xff] }
 0x2d7   : > { %2025 = vmatprep.subr.mxu0 %v3125_v62  ;;  %2135 = vmatpush1.msra.mxu1 %v2119_v29  ;;  %v2219_v62 = vld [vmem:[%s5052_s10 + $0x98] sm:$0xff] }
 0x2d8   : > { %2026 = vmatpush1.msra.mxu0 %v3124_v63  ;;  %2136 = vmatprep.subr.mxu1 %v3478_v5  ;;  %v2124_v63 = vld [vmem:[%s5051_s9 + $0x90] sm:$0xff] }
 0x2d9   : > { %2027 = vmatprep.subr.mxu0 %v3123_v0  ;;  %2137 = vmatpush1.msra.mxu1 %v2118_v31  ;;  %v2218_v0 = vld [vmem:[%s5052_s10 + $0x90] sm:$0xff]  ;;  %v2532_v31 = vld [vmem:[%s5055_s13 + $0x78] sm:$0xff] }
 0x2da   : > { %2028 = vmatpush1.msra.mxu0 %v3122_v1  ;;  %2138 = vmatprep.subr.mxu1 %v3478_v5  ;;  %v2123_v1 = vld [vmem:[%s5051_s9 + $0x88] sm:$0xff] }
 0x2db   : > { %2029 = vmatprep.subr.mxu0 %v3121_v2  ;;  %2139 = vmatpush1.msra.mxu1 %v2117_v35  ;;  %v2217_v2 = vld [vmem:[%s5052_s10 + $0x88] sm:$0xff] }
 0x2dc   : > { %2030 = vmatpush1.msra.mxu0 %v3120_v3  ;;  %2140 = vmatprep.subr.mxu1 %v3478_v5  ;;  %v2122_v3 = vld [vmem:[%s5051_s9 + $0x80] sm:$0xff] }
 0x2dd   : > { %2031 = vmatprep.subr.mxu0 %v3119_v4  ;;  %2141 = vmatpush1.msra.mxu1 %v2116_v37  ;;  %v2216_v4 = vld [vmem:[%s5052_s10 + $0x80] sm:$0xff] }
 0x2de   : > { %2032 = vmatpush1.msra.mxu0 %v3118_v6  ;;  %2142 = vmatprep.subr.mxu1 %v3478_v5 }
 0x2df   : > { %2033 = vmatprep.subr.mxu0 %v3117_v7  ;;  %2143 = vmatpush1.msra.mxu1 %v2115_v39 }
 0x2e0   : > { %2034 = vmatpush1.msra.mxu0 %v3116_v8  ;;  %2144 = vmatprep.subr.mxu1 %v3478_v5 }
 0x2e1   : > { %2035 = vmatprep.subr.mxu0 %v3115_v9  ;;  %2145 = vmatpush1.msra.mxu1 %v2114_v41  ;;  %v2366_v41 = vld [vmem:[%s5054_s12] sm:$0xf] }
 0x2e2   : > { %2036 = vmatpush1.msra.mxu0 %v3114_v10  ;;  %2146 = vmatprep.subr.mxu1 %v3478_v5 }
 0x2e3   : > { %2037 = vmatprep.subr.mxu0 %v3113_v14  ;;  %2147 = vmatpush1.msra.mxu1 %v2113_v43  ;;  %v2450_v43 = vld [vmem:[%s5055_s13 + $0x40] sm:$0xff] }
 0x2e4   : > { %2038 = vmatpush1.msra.mxu0 %v3112_v15  ;;  %2148 = vmatprep.subr.mxu1 %v3478_v5 }
 0x2e5   : > { %2039 = vmatprep.subr.mxu0 %v3111_v11  ;;  %2149 = vmatpush1.msra.mxu1 %v2112_v47  ;;  %v2448_v47 = vld [vmem:[%s5055_s13 + $0x30] sm:$0xff] }
 0x2e6   : > { %2040 = vmatpush1.msra.mxu0 %v3110_v12  ;;  %2150 = vmatprep.subr.mxu1 %v3478_v5 }
 0x2e7   : > { %2041 = vmatprep.subr.mxu0 %v3109_v16  ;;  %2151 = vmatpush1.msra.mxu1 %v2111_v49  ;;  %v2446_v49 = vld [vmem:[%s5055_s13 + $0x20] sm:$0xff] }
 0x2e8   : > { %2042 = vmatpush1.msra.mxu0 %v3108_v17  ;;  %2152 = vmatprep.subr.mxu1 %v3478_v5 }
 0x2e9   : > { %2043 = vmatprep.subr.mxu0 %v3107_v13  ;;  %2153 = vmatpush1.msra.mxu1 %v2110_v51  ;;  %v2090_v13 = vld [vmem:[%s5050_s8] sm:$0x3]  ;;  %v2444_v51 = vld [vmem:[%s5055_s13 + $0x10] sm:$0xff] }
 0x2ea   : > { %2044 = vmatpush1.msra.mxu0 %v3106_v19  ;;  %2154 = vmatprep.subr.mxu1 %v3478_v5  ;;  %v2099_v24 = vrot.slane %v2090_v13, %v1132_v33  ;;  %v2534_v33 = vld [vmem:[%s5055_s13 + $0x88] sm:$0xff] }
 0x2eb   : > { %2045 = vmatprep.subr.mxu0 %v3105_v20  ;;  %2155 = vmatpush1.msra.mxu1 %v2109_v53  ;;  %v2443_v53 = vld [vmem:[%s5055_s13 + $0x8] sm:$0xff] }
 0x2ec   : > { %2046 = vmatpush1.msra.mxu0 %v3104_v18  ;;  %2156 = vmatprep.subr.mxu1 %v3478_v5 }
 0x2ed   : > { %2047 = vmatprep.subr.mxu0 %v3103_v21  ;;  %2157 = vmatpush1.msra.mxu1 %v2108_v55  ;;  %v2095_v21 = vrot.slane %v2090_v13, %v1128_v32  ;;  %v2535_v32 = vld [vmem:[%s5055_s13 + $0x90] sm:$0xff]  ;;  %v2442_v55 = vld [vmem:[%s5055_s13] sm:$0xff] }
 0x2ee   : > { %2048 = vmatpush1.msra.mxu0 %v3102_v23  ;;  %2158 = vmatprep.subr.mxu1 %v3478_v5  ;;  %v2697_v13 = vld [vmem:[%s5055_s13 + $0x100] sm:$0xff] }
 0x2ef   : > { %3132 = vmatmul.mubr.msk.f32.vlgmr.msra.gmra.mxu0 %vm1616_vm7, %v2014_v26  ;;  %2220 = vmatprep.subr.mxu0 %v3478_v5 }
 0x2f0   : > { %2221 = vmatpush1.msra.mxu0 %v2215_v27  ;;  %2159 = vmatpush1.msra.mxu1 %v2107_v57  ;;  %v2527_v57 = vld [vmem:[%s5055_s13 + $0x50] sm:$0xff] }
 0x2f1   : > { %2222 = vmatprep.subr.mxu0 %v3478_v5  ;;  %2160 = vmatprep.subr.mxu1 %v3478_v5 }
 0x2f2   : > { %2223 = vmatpush1.msra.mxu0 %v2214_v28  ;;  %2161 = vmatpush1.msra.mxu1 %v2106_v59 }
 0x2f3   : > { %2224 = vmatprep.subr.mxu0 %v3478_v5  ;;  %2186 = vmatprep.subr.mxu1 %v3478_v5 }
 0x2f4   : > { %2225 = vmatpush1.msra.mxu0 %v2213_v30  ;;  %2187 = vmatpush2.msra.mxu1 %v2125_v61  ;;  %v2533_v30 = vld [vmem:[%s5055_s13 + $0x80] sm:$0xff] }
 0x2f5   : > { %2226 = vmatprep.subr.mxu0 %v3478_v5  ;;  %2188 = vmatprep.subr.mxu1 %v3478_v5 }
 0x2f6   : > { %2227 = vmatpush1.msra.mxu0 %v2212_v34  ;;  %2189 = vmatpush2.msra.mxu1 %v2124_v63  ;;  %v2531_v34 = vld [vmem:[%s5055_s13 + $0x70] sm:$0xff] }
 0x2f7   : > { %2228 = vmatprep.subr.mxu0 %v3478_v5  ;;  %2190 = vmatprep.subr.mxu1 %v3478_v5 }
 0x2f8   : > { %2229 = vmatpush1.msra.mxu0 %v2211_v36  ;;  %2191 = vmatpush2.msra.mxu1 %v2123_v1  ;;  %v2619_v1 = vld [vmem:[%s5055_s13 + $0xe0] sm:$0xff] }
 0x2f9   : > { %2230 = vmatprep.subr.mxu0 %v3478_v5  ;;  %2192 = vmatprep.subr.mxu1 %v3478_v5 }
 0x2fa   : > { %2231 = vmatpush1.msra.mxu0 %v2210_v38  ;;  %2193 = vmatpush2.msra.mxu1 %v2122_v3  ;;  %v2291_v38 = vld [vmem:[%s5053_s11] sm:$0xf]  ;;  %v2618_v3 = vld [vmem:[%s5055_s13 + $0xd8] sm:$0xff] }
 0x2fb   : > { %2232 = vmatprep.subr.mxu0 %v3478_v5  ;;  %3238 = vmatprep.subr.mxu1 %v3478_v5 }
 0x2fc   : > { %2233 = vmatpush1.msra.mxu0 %v2209_v40 }
 0x2fd   : > { %2234 = vmatprep.subr.mxu0 %v3478_v5 }
 0x2fe   : > { %2235 = vmatpush1.msra.mxu0 %v2208_v42  ;;  %v2451_v42 = vld [vmem:[%s5055_s13 + $0x48] sm:$0xff] }
 0x2ff   : > { %2236 = vmatprep.subr.mxu0 %v3478_v5 }
 0x300   : > { %2237 = vmatpush1.msra.mxu0 %v2207_v45  ;;  %v2449_v45 = vld [vmem:[%s5055_s13 + $0x38] sm:$0xff] }
 0x301   : > { %2238 = vmatprep.subr.mxu0 %v3478_v5 }
 0x302   : > { %2239 = vmatpush1.msra.mxu0 %v2206_v48  ;;  %v2447_v48 = vld [vmem:[%s5055_s13 + $0x28] sm:$0xff] }
 0x303   : > { %2240 = vmatprep.subr.mxu0 %v3478_v5 }
 0x304   : > { %2241 = vmatpush1.msra.mxu0 %v2205_v50  ;;  %v2445_v50 = vld [vmem:[%s5055_s13 + $0x18] sm:$0xff] }
 0x305   : > { %2242 = vmatprep.subr.mxu0 %v3478_v5 }
 0x306   : > { %2243 = vmatpush1.msra.mxu0 %v2204_v52  ;;  %v2530_v52 = vld [vmem:[%s5055_s13 + $0x68] sm:$0xff] }
 0x307   : > { %2244 = vmatprep.subr.mxu0 %v3478_v5 }
 0x308   : > { %2245 = vmatpush1.msra.mxu0 %v2203_v54  ;;  %v2529_v54 = vld [vmem:[%s5055_s13 + $0x60] sm:$0xff] }
 0x309   : > { %2246 = vmatprep.subr.mxu0 %v3478_v5 }
 0x30a   : > { %2247 = vmatpush1.msra.mxu0 %v2202_v56  ;;  %v2528_v56 = vld [vmem:[%s5055_s13 + $0x58] sm:$0xff] }
 0x30b   : > { %2248 = vmatprep.subr.mxu0 %v3478_v5 }
 0x30c   : > { %2249 = vmatpush1.msra.mxu0 %v2201_v58 }
 0x30d   : > { %2250 = vmatprep.subr.mxu0 %v3478_v5 }
 0x30e   : > { %2251 = vmatpush1.msra.mxu0 %v2200_v60 }
 0x30f   : > { %2276 = vmatprep.subr.mxu0 %v3478_v5 }
 0x310   : > { %2277 = vmatpush2.msra.mxu0 %v2219_v62  ;;  %v2620_v62 = vld [vmem:[%s5055_s13 + $0xe8] sm:$0xff] }
 0x311   : > { %2278 = vmatprep.subr.mxu0 %v3478_v5 }
 0x312   : > { %2279 = vmatpush2.msra.mxu0 %v2218_v0 }
 0x313   : > { %2280 = vmatprep.subr.mxu0 %v3478_v5 }
 0x314   : > { %2281 = vmatpush2.msra.mxu0 %v2217_v2  ;;  %v2704_v2 = vld [vmem:[%s5055_s13 + $0x138] sm:$0xff] }
 0x315   : > { %2282 = vmatprep.subr.mxu0 %v3478_v5 }
 0x316   : > { %2283 = vmatpush2.msra.mxu0 %v2216_v4  ;;  %v2703_v4 = vld [vmem:[%s5055_s13 + $0x130] sm:$0xff] }
 0x317   : > { %3271 = vmatprep.subr.mxu0 %v3478_v5 }
 0x370   : > { %v1758_v8 = vpop.f32.mrf.mxu1 }
 0x372   : > { %v1760_v14 = vpop.f32.mrf.mxu1 }
 0x373   : > { %v1685_v6 = vpop.f32.mrf.mxu0 }
 0x374   : > { %v1759_v10 = vadd.f32 %v1758_v8, %v1685_v6  ;;  %v2617_v6 = vld [vmem:[%s5055_s13 + $0xd0] sm:$0xff]  ;;  %v2616_v8 = vld [vmem:[%s5055_s13 + $0xc8] sm:$0xff] }
 0x375   : > { %v1687_v7 = vpop.f32.mrf.mxu0 }
 0x376   : > { %v1761_v11 = vadd.f32 %v1760_v14, %v1687_v7  ;;  %v2702_v7 = vld [vmem:[%s5055_s13 + $0x128] sm:$0xff]  ;;  %v2700_v14 = vld [vmem:[%s5055_s13 + $0x118] sm:$0xff] }
 0x38e   : > { %v1974_v16 = vpop.f32.mrf.mxu1 }
 0x390   : > { %v1976_v20 = vpop.f32.mrf.mxu1 }
 0x391   : > { %v1865_v9 = vpop.f32.mrf.mxu0 }
 0x392   : > { %v1870_v12 = vadd.f32 %v1865_v9, %v1759_v10  ;;  %v2701_v9 = vld [vmem:[%s5055_s13 + $0x120] sm:$0xff] }
 0x393   : > { %v1867_v15 = vpop.f32.mrf.mxu0  ;;  %v2615_v10 = vld [vmem:[%s5055_s13 + $0xc0] sm:$0xff] }
 0x394   : > { %v1871_v17 = vadd.f32 %v1867_v15, %v1761_v11  ;;  %v1979_v19 = vadd.f32 %v1974_v16, %v1870_v12  ;;  %v2614_v15 = vld [vmem:[%s5055_s13 + $0xb8] sm:$0xff]  ;;  %v2699_v11 = vld [vmem:[%s5055_s13 + $0x110] sm:$0xff]  ;;  %v2698_v16 = vld [vmem:[%s5055_s13 + $0x108] sm:$0xff] }
 0x395   : > { %v2613_v12 = vld [vmem:[%s5055_s13 + $0xb0] sm:$0xff] }
 0x396   : > { %v1980_v23 = vadd.f32 %v1976_v20, %v1871_v17  ;;  %v2612_v17 = vld [vmem:[%s5055_s13 + $0xa8] sm:$0xff]  ;;  %v2696_v20 = vld [vmem:[%s5055_s13 + $0xf8] sm:$0xff] }
 0x3af   : > { %v2083_v18 = vpop.f32.mrf.mxu0 }
 0x3b0   : > { %v2088_v22 = vadd.f32 %v2083_v18, %v1979_v19  ;;  %v2611_v19 = vld [vmem:[%s5055_s13 + $0xa0] sm:$0xff] }
 0x3b1   : > { %v2085_v26 = vpop.f32.mrf.mxu0 }
 0x3b2   : > { %v2089_v46 = vadd.f32 %v2085_v26, %v1980_v23  ;;  %v2102_v27 = vadd.f32 %v2095_v21, %v2088_v22  ;;  %v2695_v21 = vld [vmem:[%s5055_s13 + $0xf0] sm:$0xff]  ;;  %v2794_v23 = vld [vmem:[%s5057_s15 + $0x78] sm:$0xff]  ;;  %v2792_v26 = vld [vmem:[%s5057_s15 + $0x68] sm:$0xff] }
 0x3b4   : > { %v2103_v44 = vadd.f32 %v2099_v24, %v2089_v46  ;;  %v2104_v29 = vmax.f32 %v2102_v27, 0.0  ;;  %v2793_v24 = vld [vmem:[%s5057_s15 + $0x70] sm:$0xff]  ;;  %v2791_v46 = vld [vmem:[%s5057_s15 + $0x60] sm:$0xff]  ;;  %v2790_v27 = vld [vmem:[%s5057_s15 + $0x58] sm:$0xff] }
 0x3b6   : > { %v2105_v28 = vmax.f32 %v2103_v44, 0.0  ;;  %v2789_v44 = vld [vmem:[%s5057_s15 + $0x50] sm:$0xff] }
 0x3b8   : > { %3133 = vmatprep.mubr.msk.f32.mxu1 %vm2126_vm8, %v2105_v28  ;;  %3134 = vmatprep.mubr.msk.f32.mxu0 %vm2126_vm8, %v2105_v28  ;;  %v2788_v28 = vld [vmem:[%s5057_s15 + $0x48] sm:$0xff] }
 0x3b9   : > { %2195 = vmatmul.mubr.f32.vlgmr.msra.gmra.mxu1 %v2104_v29  ;;  %2285 = vmatmul.mubr.f32.vlgmr.msra.gmra.mxu0 %v2104_v29  ;;  %v2787_v29 = vld [vmem:[%s5057_s15 + $0x40] sm:$0xff] }
 0x3ba   : > { %3240 = vmatprep.mubr.msk.f32.mxu1 %vm3479_vm9, %v3478_v5  ;;  %3291 = vmatprep.mubr.msk.f32.mxu0 %vm3479_vm9, %v3478_v5 }
 0x3bb   : > { %3272 = vmatpush3.msra.mxu0 %v2536_v25  ;;  %v2786_v25 = vld [vmem:[%s5057_s15 + $0x38] sm:$0xff] }
 0x3bc   : > { %3273 = vmatprep.subr.mxu0 %v3478_v5 }
 0x3bd   : > { %3274 = vmatpush3.msra.mxu0 %v2535_v32  ;;  %v2785_v32 = vld [vmem:[%s5057_s15 + $0x30] sm:$0xff] }
 0x3be   : > { %3275 = vmatprep.subr.mxu0 %v3478_v5 }
 0x3bf   : > { %3276 = vmatpush3.msra.mxu0 %v2534_v33  ;;  %v2784_v33 = vld [vmem:[%s5057_s15 + $0x28] sm:$0xff] }
 0x3c0   : > { %3277 = vmatprep.subr.mxu0 %v3478_v5 }
 0x3c1   : > { %3278 = vmatpush3.msra.mxu0 %v2533_v30  ;;  %v2783_v30 = vld [vmem:[%s5057_s15 + $0x20] sm:$0xff] }
 0x3c2   : > { %3279 = vmatprep.subr.mxu0 %v3478_v5 }
 0x3c3   : > { %3280 = vmatpush3.msra.mxu0 %v2532_v31  ;;  %v2782_v31 = vld [vmem:[%s5057_s15 + $0x18] sm:$0xff] }
 0x3c4   : > { %3281 = vmatprep.subr.mxu0 %v3478_v5 }
 0x3c5   : > { %3282 = vmatpush3.msra.mxu0 %v2531_v34  ;;  %v2781_v34 = vld [vmem:[%s5057_s15 + $0x10] sm:$0xff] }
 0x3c6   : > { %3283 = vmatprep.subr.mxu0 %v3478_v5 }
 0x3c7   : > { %3284 = vmatpush3.msra.mxu0 %v2530_v52 }
 0x3c8   : > { %3285 = vmatprep.subr.mxu0 %v3478_v5 }
 0x3c9   : > { %3286 = vmatpush3.msra.mxu0 %v2529_v54 }
 0x3ca   : > { %3287 = vmatprep.subr.mxu0 %v3478_v5 }
 0x3cb   : > { %3288 = vmatpush3.msra.mxu0 %v2528_v56 }
 0x3cc   : > { %3289 = vmatprep.subr.mxu0 %v3478_v5 }
 0x3cd   : > { %3290 = vmatpush3.msra.mxu0 %v2527_v57 }
 0x3ce   : > { %3317 = vmatprep.subr.mxu0 %v3478_v5 }
 0x479   : > { %v2196_v35 = vpop.f32.mrf.mxu1  ;;  %v2286_v36 = vpop.f32.mrf.mxu0 }
 0x47a   : > { %v2290_v37 = vmax.f32 %v2196_v35, %v2286_v36  ;;  %v2780_v35 = vld [vmem:[%s5057_s15 + $0x8] sm:$0xff]  ;;  %v2779_v36 = vld [vmem:[%s5057_s15] sm:$0xff] }
 0x47b   : > { %v2198_v39 = vpop.f32.mrf.mxu1  ;;  %v2288_v40 = vpop.f32.mrf.mxu0 }
 0x47c   : > { %3239 = vmatpush3.msra.mxu1 %v2290_v37 }
 0x47d   : > { %3241 = vmatmul.mubr.msk.f32.vlgmr.msra.gmra.mxu1 %vm2292_vm10, %v2291_v38  ;;  %3243 = vmatprep.subr.mxu1 %v3478_v5 }
 0x47e   : > { %3244 = vmatpush3.msra.mxu1 %v2290_v37  ;;  %3245 = vmatprep.mubr.msk.f32.mxu1 %vm3479_vm9, %v3478_v5 }
 0x47f   : > { %3248 = vmatprep.subr.mxu1 %v3478_v5 }
 0x481   : > { %3246 = vmatmul.mubr.msk.f32.vlgmr.msra.gmra.mxu1 %vm2292_vm10, %v2366_v41  ;;  %v2441_v41 = vld [vmem:[%s5056_s14] sm:$0x1] }
 0x482   : > { %3249 = vmatpush3.msra.mxu1 %v2451_v42  ;;  %3268 = vmatprep.mubr.msk.f32.mxu1 %vm3479_vm9, %v3478_v5 }
 0x483   : > { %3250 = vmatprep.subr.mxu1 %v3478_v5 }
 0x484   : > { %3251 = vmatpush3.msra.mxu1 %v2450_v43 }
 0x485   : > { %3252 = vmatprep.subr.mxu1 %v3478_v5 }
 0x486   : > { %3253 = vmatpush3.msra.mxu1 %v2449_v45 }
 0x487   : > { %3254 = vmatprep.subr.mxu1 %v3478_v5 }
 0x488   : > { %3255 = vmatpush3.msra.mxu1 %v2448_v47 }
 0x489   : > { %3256 = vmatprep.subr.mxu1 %v3478_v5 }
 0x48a   : > { %3257 = vmatpush3.msra.mxu1 %v2447_v48 }
 0x48b   : > { %3258 = vmatprep.subr.mxu1 %v3478_v5 }
 0x48c   : > { %3259 = vmatpush3.msra.mxu1 %v2446_v49 }
 0x48d   : > { %3260 = vmatprep.subr.mxu1 %v3478_v5 }
 0x48e   : > { %3261 = vmatpush3.msra.mxu1 %v2445_v50 }
 0x48f   : > { %3262 = vmatprep.subr.mxu1 %v3478_v5 }
 0x490   : > { %3263 = vmatpush3.msra.mxu1 %v2444_v51  ;;  %v2795_v51 = vld [vmem:[%s5086_s0] sm:$0x1] }
 0x491   : > { %3264 = vmatprep.subr.mxu1 %v3478_v5 }
 0x492   : > { %3265 = vmatpush3.msra.mxu1 %v2443_v53 }
 0x493   : > { %3266 = vmatprep.subr.mxu1 %v3478_v5 }
 0x494   : > { %3267 = vmatpush3.msra.mxu1 %v2442_v55 }
 0x495   : > { %3294 = vmatprep.subr.mxu1 %v3478_v5 }
 0x53d   : > { %v2362_v58 = vpop.f32.mrf.mxu1 }
 0x53f   : > { %v3242_v59 = vpop.f32.mrf.mxu1 }
 0x541   : > { %v2436_v60 = vpop.f32.mrf.mxu1 }
 0x542   : > { %v4838_v61 = vmax.f32 %v2362_v58, %v2436_v60 }
 0x543   : > { %v3247_v63 = vpop.f32.mrf.mxu1 }
 0x544   : > { %v2537_v0 = vrot.slane %v4838_v61, 1  ;;  %3269 = vmatmul.mubr.msk.f32.vlgmr.msra.gmra.mxu1 %vm2452_vm11, %v4838_v61  ;;  %v2621_v18 = vrot.slane %v4838_v61, 2  ;;  %v2705_v22 = vrot.slane %v4838_v61, 3 }
 0x545   : > { %3295 = vmatpush3.msra.mxu1 %v2620_v62  ;;  %3314 = vmatprep.mubr.msk.f32.mxu1 %vm3479_vm9, %v3478_v5 }
 0x546   : > { %3296 = vmatprep.subr.mxu1 %v3478_v5  ;;  %3292 = vmatmul.mubr.msk.f32.vlgmr.msra.gmra.mxu0 %vm2452_vm11, %v2537_v0 }
 0x547   : > { %3297 = vmatpush3.msra.mxu1 %v2619_v1  ;;  %3318 = vmatpush3.msra.mxu0 %v2704_v2 }
 0x548   : > { %3298 = vmatprep.subr.mxu1 %v3478_v5  ;;  %3319 = vmatprep.subr.mxu0 %v3478_v5 }
 0x549   : > { %3299 = vmatpush3.msra.mxu1 %v2618_v3  ;;  %3320 = vmatpush3.msra.mxu0 %v2703_v4 }
 0x54a   : > { %3300 = vmatprep.subr.mxu1 %v3478_v5  ;;  %3321 = vmatprep.subr.mxu0 %v3478_v5 }
 0x54b   : > { %3301 = vmatpush3.msra.mxu1 %v2617_v6  ;;  %3322 = vmatpush3.msra.mxu0 %v2702_v7 }
 0x54c   : > { %3302 = vmatprep.subr.mxu1 %v3478_v5  ;;  %3323 = vmatprep.subr.mxu0 %v3478_v5 }
 0x54d   : > { %3303 = vmatpush3.msra.mxu1 %v2616_v8  ;;  %3324 = vmatpush3.msra.mxu0 %v2701_v9 }
 0x54e   : > { %3304 = vmatprep.subr.mxu1 %v3478_v5  ;;  %3325 = vmatprep.subr.mxu0 %v3478_v5 }
 0x54f   : > { %3305 = vmatpush3.msra.mxu1 %v2615_v10  ;;  %3326 = vmatpush3.msra.mxu0 %v2700_v14 }
 0x550   : > { %3306 = vmatprep.subr.mxu1 %v3478_v5  ;;  %3327 = vmatprep.subr.mxu0 %v3478_v5 }
 0x551   : > { %3307 = vmatpush3.msra.mxu1 %v2614_v15  ;;  %3328 = vmatpush3.msra.mxu0 %v2699_v11 }
 0x552   : > { %3308 = vmatprep.subr.mxu1 %v3478_v5  ;;  %3329 = vmatprep.subr.mxu0 %v3478_v5 }
 0x553   : > { %3309 = vmatpush3.msra.mxu1 %v2613_v12  ;;  %3330 = vmatpush3.msra.mxu0 %v2698_v16 }
 0x554   : > { %3310 = vmatprep.subr.mxu1 %v3478_v5  ;;  %3331 = vmatprep.subr.mxu0 %v3478_v5 }
 0x555   : > { %3311 = vmatpush3.msra.mxu1 %v2612_v17  ;;  %3332 = vmatpush3.msra.mxu0 %v2697_v13 }
 0x556   : > { %3312 = vmatprep.subr.mxu1 %v3478_v5  ;;  %3333 = vmatprep.subr.mxu0 %v3478_v5 }
 0x557   : > { %3313 = vmatpush3.msra.mxu1 %v2611_v19  ;;  %3334 = vmatpush3.msra.mxu0 %v2696_v20 }
 0x558   : > { %3315 = vmatmul.mubr.msk.f32.vlgmr.msra.gmra.mxu1 %vm2452_vm11, %v2621_v18  ;;  %3335 = vmatprep.subr.mxu0 %v3478_v5 }
 0x559   : > { %3336 = vmatpush3.msra.mxu0 %v2695_v21  ;;  %3337 = vmatprep.mubr.msk.f32.mxu0 %vm3479_vm9, %v3478_v5 }
 0x55a   : > { %3338 = vmatmul.mubr.msk.f32.vlgmr.msra.gmra.mxu0 %vm2452_vm11, %v2705_v22  ;;  %3340 = vmatprep.subr.mxu1 %v3478_v5 }
 0x55b   : > { %3341 = vmatpush3.msra.mxu1 %v2794_v23  ;;  %3372 = vmatprep.mubr.msk.f32.mxu1 %vm3479_vm9, %v3478_v5 }
 0x55c   : > { %3342 = vmatprep.subr.mxu1 %v3478_v5 }
 0x55d   : > { %3343 = vmatpush3.msra.mxu1 %v2793_v24 }
 0x55e   : > { %3344 = vmatprep.subr.mxu1 %v3478_v5 }
 0x55f   : > { %3345 = vmatpush3.msra.mxu1 %v2792_v26 }
 0x560   : > { %3346 = vmatprep.subr.mxu1 %v3478_v5 }
 0x561   : > { %3347 = vmatpush3.msra.mxu1 %v2791_v46 }
 0x562   : > { %3348 = vmatprep.subr.mxu1 %v3478_v5 }
 0x563   : > { %3349 = vmatpush3.msra.mxu1 %v2790_v27 }
 0x564   : > { %3350 = vmatprep.subr.mxu1 %v3478_v5 }
 0x565   : > { %3351 = vmatpush3.msra.mxu1 %v2789_v44 }
 0x566   : > { %3352 = vmatprep.subr.mxu1 %v3478_v5 }
 0x567   : > { %3353 = vmatpush3.msra.mxu1 %v2788_v28 }
 0x568   : > { %3354 = vmatprep.subr.mxu1 %v3478_v5 }
 0x569   : > { %3355 = vmatpush3.msra.mxu1 %v2787_v29 }
 0x56a   : > { %3356 = vmatprep.subr.mxu1 %v3478_v5 }
 0x56b   : > { %3357 = vmatpush3.msra.mxu1 %v2786_v25 }
 0x56c   : > { %3358 = vmatprep.subr.mxu1 %v3478_v5 }
 0x56d   : > { %3359 = vmatpush3.msra.mxu1 %v2785_v32 }
 0x56e   : > { %3360 = vmatprep.subr.mxu1 %v3478_v5 }
 0x56f   : > { %3361 = vmatpush3.msra.mxu1 %v2784_v33 }
 0x570   : > { %3362 = vmatprep.subr.mxu1 %v3478_v5 }
 0x571   : > { %3363 = vmatpush3.msra.mxu1 %v2783_v30 }
 0x572   : > { %3364 = vmatprep.subr.mxu1 %v3478_v5 }
 0x573   : > { %3365 = vmatpush3.msra.mxu1 %v2782_v31 }
 0x574   : > { %3366 = vmatprep.subr.mxu1 %v3478_v5 }
 0x575   : > { %3367 = vmatpush3.msra.mxu1 %v2781_v34 }
 0x576   : > { %3368 = vmatprep.subr.mxu1 %v3478_v5 }
 0x577   : > { %3369 = vmatpush3.msra.mxu1 %v2780_v35 }
 0x578   : > { %3370 = vmatprep.subr.mxu1 %v3478_v5 }
 0x579   : > { %3371 = vmatpush3.msra.mxu1 %v2779_v36 }
 0x604   : > { %v2522_v37 = vpop.f32.mrf.mxu1 }
 0x605   : > { %v2526_v42 = vadd.f32 %v2522_v37, %v2441_v41 }
 0x606   : > { %v3270_v38 = vpop.f32.mrf.mxu1  ;;  %v2606_v39 = vpop.f32.mrf.mxu0 }
 0x607   : > { %v2610_v43 = vadd.f32 %v2606_v39, %v2526_v42 }
 0x608   : > { %v3293_v40 = vpop.f32.mrf.mxu0 }
 0x618   : > { %v2690_v45 = vpop.f32.mrf.mxu1 }
 0x619   : > { %v2694_v47 = vadd.f32 %v2690_v45, %v2610_v43 }
 0x61a   : > { %v3316_v5 = vpop.f32.mrf.mxu1  ;;  %v2774_v48 = vpop.f32.mrf.mxu0 }
 0x61b   : > { %v2778_v49 = vadd.f32 %v2774_v48, %v2694_v47 }
 0x61c   : > { %v3339_v50 = vpop.f32.mrf.mxu0 }
 0x61d   : > { %3373 = vmatmul.mubr.f32.vlgmr.msra.gmra.mxu1 %v2778_v49 }
 0x6dd   : > { %v2862_v52 = vpop.f32.mrf.mxu1 }
 0x6de   : > { %v2863_v53 = vadd.f32 %v2862_v52, %v2795_v51 }
 0x6df   : > { %v3374_v54 = vpop.f32.mrf.mxu1 }
 0x6e0   : > { %2866 = vst [vmem:[%s540_s21] sm:$0x1] %v2863_v53 }
 0x6e1   : > { %3429 = shalt.err (!%p3426_p3)
}
 0x6e2   : > { %s3430_s0 = scalar_lea.hbm %s5007_s17, 16  ;;  %s3434_s21 = scalar_lea.hbm %s5087_s16, 64 }
 0x6e3   : > { %p3431_p4 = scmp.ne.s32.totalorder %s5007_s17, %s3430_s0  ;;  %p3435_p9 = scmp.lt.s32.totalorder %s5007_s17, %s5087_s16 }
 0x6e4   : > { %p3436_p10 = scmp.lt.s32.totalorder %s3434_s21, %s3430_s0 }
 0x6e5   : > { %p3432_p7 = pnand %p3431_p4, %p3609_p5 }
 0x6e6   : > { %p3437_p11 = por %p3436_p10, %p3435_p9 }
 0x6e7   : > { %p3433_p8 = pneg %p3432_p7 }
 0x6e9   : > { %p3438_p12 = pnand %p3437_p11, %p3433_p8 }
 0x6eb   : > { %3441 = shalt.err (!%p3438_p12)
}
 0x6ec   : > { %3375 = dma.vmem_to_hbm [thread:$0]  (%p3609_p5), %s2881_s22, 16, %s5007_s17, %s2868_s24  }
 0x6ed PF: > { %s5088_s27 = sld [smem:[#allocation7_spill]] }
 0x6ee   : > { %s5089_s30 = sld [smem:[#allocation5_spill]] }
 0x6f3   : > { %p3381_p13 = scmp.ge.s32.totalorder %s5088_s27, 2 }
 0x6f4   : > { %s2892_s26 = sand.u32 1, %s5089_s30  }
 0x6f5   : > { %p3378_p0 = pnand %p3381_p13, %p3613_p6  ;;  %s2893_s20 = scalar_lea.sflag [#allocation3], %s2892_s26 }
 0x6f7   : > { %p3379_p1 = pneg %p3378_p0 }
 0x6f9   : > { %3459 = dma.done.wait (%p3379_p1), %s2893_s20, 16  }
 0x6fa   : > { %3461 = vsyncadd (%p3379_p1), %s2893_s20, 4294967280  ;;  %s5091_s27 = sld [smem:[#allocation8_spill]]  ;;  %s5094_s24 = smov %s3468_s25 }
 0x6fb   : > { %s5092_s0 = sld [smem:[#allocation6_spill]] }
 0x6fc   : > { %s5093_s26 = sld [smem:[#allocation9_spill]] }
 0x700   : > { %p27_p2 = scmp.ge.s32.totalorder %s5091_s27, 6  }
 0x701   : > { %s5095_s25 = smov %s5092_s0 }
 0x702   :  { %29 = sbr.rel (!%p27_p2) target bundleno = 8 (0x8), region = 131 }
 0x707   :  { %2897 = vsyncpa [#allocation3], 1 }
 0x708   :  { %2899 = vsyncpa [#allocation3 + $0x1], 1 }

</bundles_post_ra>
